<compile_context>
chip_gen: v7x
topology: tpu7x:2x2x1
jax: 0.10.0
libtpu: 0.0.40
codegen_flags: <defaults>
</compile_context>

<pallas_src>
import functools

import jax
import jax.numpy as jnp
from jax.experimental import pallas as pl
from jax.experimental.pallas import tpu as pltpu


# ----------------------------------------------------------------------------
# Fused Pallas kernel: screen encoder (folded 1x1 conv) + fc head
# ----------------------------------------------------------------------------

def _fused_encoder_kernel(codes_ref, hb_ref, table_ref, sb_ref,
                          w1s_ref, w2_ref, b2_ref, g_ref, beta_ref,
                          o_ref,
                          acc_ref,
                          *, n_char, n_color):
    """Grid = (batch tiles ["parallel"], pixel tiles ["arbitrary"]).

    codes: (tb, tp, 1) int32 packed screen codes (char | color << 8).  The
    trailing size-1 lane dim makes the flatten to a (tb*tp, 1) column a pure
    relabel, so the one-hot build is a single broadcast compare per table and
    the embedding lookup is ONE lane-dense K=384 MXU matmul per tile.
    """
    p_idx = pl.program_id(1)

    @pl.when(p_idx == 0)
    def _init():
        acc_ref[...] = jnp.zeros_like(acc_ref)

    codes = codes_ref[...]                                   # (tb, tp, 1) int32
    tb, tp, _ = codes.shape
    m = tb * tp
    codes = codes.reshape(m, 1)                              # leading-dim merge only
    char_code = jnp.bitwise_and(codes, 0xFF)                 # (m, 1)
    color_code = jnp.right_shift(codes, 8)                   # (m, 1)

    # Hoisted 2-D iotas; one-hot build is exactly compare + convert (binding VPU cost).
    char_iota = jax.lax.broadcasted_iota(jnp.int32, (m, n_char), 1)
    color_iota = jax.lax.broadcasted_iota(jnp.int32, (m, n_color), 1)
    ch_oh = (char_code == char_iota).astype(jnp.bfloat16)    # (m, 256)
    co_oh = (color_code == color_iota).astype(jnp.bfloat16)  # (m, 128)
    two_hot = jnp.concatenate([ch_oh, co_oh], axis=1)        # (m, 384)

    # Single K=384 matmul against the stacked [char_proj; color_proj] table.
    h = jnp.dot(two_hot, table_ref[...], preferred_element_type=jnp.float32)
    h = jnp.maximum(h + sb_ref[...], 0.0)                    # ReLU, (m, D)
    d = h.shape[1]
    # Per-sample pooling: rows are sample-major, tp is a multiple of 8, so the
    # reshape is a relabel and the sum is a sublane reduce per sample.
    acc_ref[...] += jnp.sum(h.reshape(tb, tp, d), axis=1)    # (tb, D)

    @pl.when(p_idx == pl.num_programs(1) - 1)
    def _finalize():
        # Mean-pool 1/P is folded into w1s; hb already holds
        # lang@W1_lang + blstats@W1_bl + prev@W1_act + b1.
        h1 = (jnp.dot(acc_ref[...], w1s_ref[...], preferred_element_type=jnp.float32)
              + hb_ref[...])
        # ELU(alpha=1), exp only ever sees values <= 0.
        h1 = jnp.where(h1 > 0.0, h1, jnp.exp(jnp.minimum(h1, 0.0)) - 1.0)
        h2 = jnp.dot(h1, w2_ref[...], preferred_element_type=jnp.float32) + b2_ref[...]
        mu = jnp.mean(h2, axis=-1, keepdims=True)
        var = jnp.mean((h2 - mu) ** 2, axis=-1, keepdims=True)
        inv = jax.lax.rsqrt(var + 1e-5)
        o_ref[...] = ((h2 - mu) * inv * g_ref[...] + beta_ref[...]).astype(o_ref.dtype)


def _pick_tiles(B, P, pixel_tile):
    # Pixel tile: collapse the reduction axis when the screen is small (single
    # grid step, no accumulator round trips); otherwise the largest multiple of
    # 8 dividing P that is <= pixel_tile.
    if P <= pixel_tile:
        tp = P
    else:
        tp = (pixel_tile // 8) * 8
        while tp > 8 and P % tp:
            tp -= 8
        if tp < 8 or P % tp:
            tp = P
    # Batch tile: multiple of 8 (layout rule) with >= 2 "parallel" grid steps
    # when the batch is big enough (v7x has 2 TensorCores); tiny batches take
    # the full extent (block == full dim is also layout-legal).
    if B >= 16 and B % 8 == 0:
        tb = min(64, max(8, (B // 2) // 8 * 8))
        while B % tb:
            tb -= 8
        tb = max(tb, 8)
    else:
        tb = B
    return tb, tp


def fused_encoder_forward(codes, head_bias, table, screen_b, w1_screen_scaled,
                          w2, b2, ln_gamma, ln_beta,
                          *, n_char=256, n_color=128, pixel_tile=512):
    B, P, _ = codes.shape
    assert P % 8 == 0, "pixel count must be a multiple of 8"
    D = table.shape[1]
    Dh = w2.shape[1]
    tb, tp = _pick_tiles(B, P, pixel_tile)
    grid = (B // tb, P // tp)

    def full2d(a):
        return pl.BlockSpec(a.shape, lambda i, j: (0, 0))

    kernel = functools.partial(_fused_encoder_kernel, n_char=n_char, n_color=n_color)

    return pl.pallas_call(
        kernel,
        out_shape=jax.ShapeDtypeStruct((B, Dh), jnp.float32),
        grid=grid,
        in_specs=[
            pl.BlockSpec((tb, tp, 1), lambda i, j: (i, j, 0)),   # packed codes
            pl.BlockSpec((tb, Dh), lambda i, j: (i, 0)),         # precomputed head bias
            full2d(table),                                       # stacked bf16 table (384, D)
            full2d(screen_b),                                    # (1, D)
            full2d(w1_screen_scaled),                            # (D, Dh), includes 1/P
            full2d(w2), full2d(b2), full2d(ln_gamma), full2d(ln_beta),
        ],
        out_specs=pl.BlockSpec((tb, Dh), lambda i, j: (i, 0)),
        scratch_shapes=[pltpu.VMEM((tb, D), jnp.float32)],
        compiler_params=pltpu.CompilerParams(
            dimension_semantics=("parallel", "arbitrary"),
            vmem_limit_bytes=32 * 1024 * 1024),
    )(codes, head_bias, table, screen_b, w1_screen_scaled, w2, b2, ln_gamma, ln_beta)


# ----------------------------------------------------------------------------
# SimBaHybridEncoder (JAX/Pallas wrapper)
# ----------------------------------------------------------------------------

class SimBaHybridEncoderPallas:
    """Mirrors SimBaHybridEncoder.forward (use_learned_embeddings=True,
    use_prev_action=True).  Sub-encoders whose PyTorch definitions were not
    provided are replaced by deterministic stand-ins (see TODOs)."""

    def __init__(self, key, *, H=16, W=16, blstats_dim=27, num_actions=8,
                 hidden_dim=128, char_edim=16, color_edim=16,
                 lang_vocab=32, lang_seq=8, transformer_hidden_size=64,
                 pixel_tile=512):
        self.hidden_dim = hidden_dim
        self.num_actions = num_actions
        self.pixel_tile = pixel_tile
        f32 = jnp.float32
        ks = jax.random.split(key, 12)

        # nn.Embedding(256, char_edim) / nn.Embedding(128, color_edim)
        char_emb = 0.1 * jax.random.normal(ks[0], (256, char_edim), f32)
        color_emb = 0.1 * jax.random.normal(ks[1], (128, color_edim), f32)

        # TODO(synk): SimBaCNN definition not provided; stand-in = pointwise conv
        # (Cin -> hidden_dim) + ReLU + global mean pool.  The 1x1 conv is folded
        # into the embedding tables and the two tables are stacked into one
        # (384, D) bf16 weight so the kernel does a single K=384 matmul.
        cin = char_edim + color_edim
        screen_w = (1.0 / jnp.sqrt(cin)) * jax.random.normal(ks[2], (cin, hidden_dim), f32)
        char_proj = char_emb @ screen_w[:char_edim]                   # (256, D)
        color_proj = color_emb @ screen_w[char_edim:]                 # (128, D)
        self.screen_table = jnp.concatenate([char_proj, color_proj],
                                            axis=0).astype(jnp.bfloat16)  # (384, D)
        self.screen_b = 0.01 * jax.random.normal(ks[3], (1, hidden_dim), f32)

        # TODO(synk): RobertaTransformer definition not provided; stand-in =
        # token embedding + mean pool producing transformer_hidden_size feats.
        self.lang_table = 0.1 * jax.random.normal(ks[4], (lang_vocab, transformer_hidden_size), f32)
        self.lang_dim = transformer_hidden_size

        # TODO(synk): BLStatsEncoder definition not provided; stand-in = identity.
        self.blstats_dim = blstats_dim

        # fc = Linear(out_dim, hidden) -> ELU -> Linear(hidden, hidden) -> LayerNorm.
        # W1 is split per feature source; the lang/blstats/prev parts are folded
        # into a per-sample head bias outside the kernel.
        out_dim = transformer_hidden_size + blstats_dim + hidden_dim + num_actions
        std1 = 1.0 / jnp.sqrt(out_dim)
        self.w1_lang = std1 * jax.random.normal(ks[5], (transformer_hidden_size, hidden_dim), f32)
        self.w1_bl = std1 * jax.random.normal(ks[6], (blstats_dim, hidden_dim), f32)
        self.w1_screen = std1 * jax.random.normal(ks[7], (hidden_dim, hidden_dim), f32)
        self.w1_act = std1 * jax.random.normal(ks[8], (num_actions, hidden_dim), f32)
        self.b1 = 0.01 * jax.random.normal(ks[9], (1, hidden_dim), f32)
        self.w2 = (1.0 / jnp.sqrt(hidden_dim)) * jax.random.normal(ks[10], (hidden_dim, hidden_dim), f32)
        self.b2 = 0.01 * jax.random.normal(ks[11], (1, hidden_dim), f32)
        self.ln_gamma = jnp.ones((1, hidden_dim), f32)
        self.ln_beta = jnp.zeros((1, hidden_dim), f32)

    # --- feature glue (cheap, plain JAX) ---
    def _features(self, obs_dict):
        screen_image = obs_dict["screen_image"]            # (B, 2, H, W) int codes
        B = screen_image.shape[0]
        P = screen_image.shape[2] * screen_image.shape[3]
        chars = screen_image[:, 0].reshape(B, P).astype(jnp.int32)
        colors = screen_image[:, 1].reshape(B, P).astype(jnp.int32)
        lang = jnp.mean(
            jnp.take(self.lang_table, obs_dict["message"].astype(jnp.int32), axis=0),
            axis=1)                                        # (B, lang_dim)
        blstats = obs_dict["blstats"].astype(jnp.float32)  # (B, blstats_dim)
        prev = jax.nn.one_hot(
            obs_dict["prev_actions"].reshape(B).astype(jnp.int32),
            self.num_actions, dtype=jnp.float32)           # (B, A)
        return chars, colors, lang, blstats, prev

    def __call__(self, obs_dict):
        chars, colors, lang, blstats, prev = self._features(obs_dict)
        B, P = chars.shape
        # Pack char|color into one int32 per pixel: 4 B/pixel HBM traffic.
        codes = jnp.bitwise_or(chars, jnp.left_shift(colors, 8)).reshape(B, P, 1)
        # Fold non-screen features + b1 into a per-sample head bias (tiny; XLA
        # overlaps it with the kernel), and 1/P mean-pool into w1_screen.
        head_bias = (lang @ self.w1_lang + blstats @ self.w1_bl
                     + prev @ self.w1_act + self.b1)
        w1s_scaled = self.w1_screen * (1.0 / float(P))
        return fused_encoder_forward(
            codes, head_bias, self.screen_table, self.screen_b, w1s_scaled,
            self.w2, self.b2, self.ln_gamma, self.ln_beta,
            n_char=256, n_color=128, pixel_tile=self.pixel_tile)

    # Pure-JAX reference (same parameters) for correctness checking.
    def reference_forward(self, obs_dict):
        chars, colors, lang, blstats, prev = self._features(obs_dict)
        cproj = self.screen_table[:256].astype(jnp.float32)
        kproj = self.screen_table[256:].astype(jnp.float32)
        h = jnp.take(cproj, chars, axis=0) + jnp.take(kproj, colors, axis=0) + self.screen_b
        h = jnp.maximum(h, 0.0)
        screen_enc = jnp.mean(h, axis=1)                   # (B, D)
        h1 = (screen_enc @ self.w1_screen + lang @ self.w1_lang
              + blstats @ self.w1_bl + prev @ self.w1_act + self.b1)
        h1 = jnp.where(h1 > 0.0, h1, jnp.exp(jnp.minimum(h1, 0.0)) - 1.0)
        h2 = h1 @ self.w2 + self.b2
        mu = jnp.mean(h2, axis=-1, keepdims=True)
        var = jnp.mean((h2 - mu) ** 2, axis=-1, keepdims=True)
        return (h2 - mu) * jax.lax.rsqrt(var + 1e-5) * self.ln_gamma + self.ln_beta


# ----------------------------------------------------------------------------
# main
# ----------------------------------------------------------------------------

if __name__ == "__main__":
    key = jax.random.PRNGKey(0)
    k_params, k_chr, k_col, k_bl, k_msg, k_act = jax.random.split(key, 6)

    B, H, W = 2, 16, 16
    enc = SimBaHybridEncoderPallas(k_params, H=H, W=W)

    screen_image = jnp.stack(
        [jax.random.randint(k_chr, (B, H, W), 0, 256, dtype=jnp.int32),   # chars
         jax.random.randint(k_col, (B, H, W), 0, 128, dtype=jnp.int32)],  # colors
        axis=1)                                                            # (B, 2, H, W)

    obs_dict = {
        "screen_image": screen_image,
        "blstats": jax.random.normal(k_bl, (B, 27), jnp.float32),
        "message": jax.random.randint(k_msg, (B, 8), 0, 32, dtype=jnp.int32),
        "prev_actions": jax.random.randint(k_act, (B,), 0, 8, dtype=jnp.int32),
    }

    out = jax.block_until_ready(enc(obs_dict))
    ref = jax.block_until_ready(enc.reference_forward(obs_dict))

    assert out.shape == (B, 128) and out.dtype == jnp.float32
    assert bool(jnp.all(jnp.isfinite(out)))
    max_err = float(jnp.max(jnp.abs(out - ref)))
    assert bool(jnp.allclose(out, ref, rtol=2e-2, atol=2e-2)), f"max err {max_err}"
    print("KERNEL_OK")
</pallas_src>

<mosaic_0001>
module attributes {stable_mosaic.version = 11 : i64} {
  func.func @_fused_encoder_kernel(%arg0: i32, %arg1: i32, %arg2: memref<2x256x1xi32, #tpu.memory_space<vmem>>, %arg3: memref<2x128xf32, #tpu.memory_space<vmem>>, %arg4: memref<384x128xbf16, #tpu.memory_space<vmem>>, %arg5: memref<1x128xf32, #tpu.memory_space<vmem>>, %arg6: memref<128x128xf32, #tpu.memory_space<vmem>>, %arg7: memref<128x128xf32, #tpu.memory_space<vmem>>, %arg8: memref<1x128xf32, #tpu.memory_space<vmem>>, %arg9: memref<1x128xf32, #tpu.memory_space<vmem>>, %arg10: memref<1x128xf32, #tpu.memory_space<vmem>>, %arg11: memref<2x128xf32, #tpu.memory_space<vmem>>, %arg12: memref<2x128xf32, #tpu.memory_space<vmem>>) attributes {dimension_semantics = [#tpu.dimension_semantics<parallel>, #tpu.dimension_semantics<arbitrary>], iteration_bounds = array<i64: 1, 1>, scalar_prefetch = 0 : i64, scratch_operands = 1 : i64, tpu.core_type = #tpu.core_type<tc>, window_params = [{transform_indices = @transform_0, window_bounds = array<i64: 2, 256, 1>}, {transform_indices = @transform_1, window_bounds = array<i64: 2, 128>}, {pipeline_mode = #tpu.pipeline_mode<synchronous>, transform_indices = @transform_2, window_bounds = array<i64: 384, 128>}, {pipeline_mode = #tpu.pipeline_mode<synchronous>, transform_indices = @transform_3, window_bounds = array<i64: 1, 128>}, {pipeline_mode = #tpu.pipeline_mode<synchronous>, transform_indices = @transform_4, window_bounds = array<i64: 128, 128>}, {pipeline_mode = #tpu.pipeline_mode<synchronous>, transform_indices = @transform_5, window_bounds = array<i64: 128, 128>}, {pipeline_mode = #tpu.pipeline_mode<synchronous>, transform_indices = @transform_6, window_bounds = array<i64: 1, 128>}, {pipeline_mode = #tpu.pipeline_mode<synchronous>, transform_indices = @transform_7, window_bounds = array<i64: 1, 128>}, {pipeline_mode = #tpu.pipeline_mode<synchronous>, transform_indices = @transform_8, window_bounds = array<i64: 1, 128>}, {transform_indices = @transform_9, window_bounds = array<i64: 2, 128>}]} {
    %c0_i32 = arith.constant 0 : i32
    %0 = arith.cmpi eq, %arg1, %c0_i32 : i32
    %1 = arith.extui %0 : i1 to i32
    %c0_i32_0 = arith.constant 0 : i32
    %2 = arith.cmpi ne, %1, %c0_i32_0 : i32
    scf.if %2 {
      %cst_15 = arith.constant 0.000000e+00 : f32
      %37 = vector.broadcast %cst_15 : f32 to vector<2x128xf32>
      %c0_16 = arith.constant 0 : index
      %c0_17 = arith.constant 0 : index
      %38 = vector.load %arg12[%c0_16, %c0_17] : memref<2x128xf32, #tpu.memory_space<vmem>>, vector<2x128xf32>
      tpu.vector_store %arg12[%c0_16, %c0_17], %37 {strides = array<i32>} : memref<2x128xf32, #tpu.memory_space<vmem>>, vector<2x128xf32>,
    } else {
    }
    %c0 = arith.constant 0 : index
    %c0_1 = arith.constant 0 : index
    %c0_2 = arith.constant 0 : index
    %3 = vector.load %arg2[%c0, %c0_1, %c0_2] : memref<2x256x1xi32, #tpu.memory_space<vmem>>, vector<2x256x1xi32>
    %4 = vector.shape_cast %3 : vector<2x256x1xi32> to vector<512x1xi32>
    %c255_i32 = arith.constant 255 : i32
    %5 = vector.broadcast %c255_i32 : i32 to vector<512x1xi32>
    %6 = arith.andi %4, %5 : vector<512x1xi32>
    %c8_i32 = arith.constant 8 : i32
    %7 = vector.broadcast %c8_i32 : i32 to vector<512x1xi32>
    %8 = arith.shrsi %4, %7 : vector<512x1xi32>
    %9 = tpu.iota {dimensions = array<i32: 1>} : vector<512x256xi32>
    %10 = tpu.iota {dimensions = array<i32: 1>} : vector<512x128xi32>
    %11 = vector.broadcast %6 : vector<512x1xi32> to vector<512x256xi32>
    %12 = arith.cmpi eq, %11, %9 : vector<512x256xi32>
    %13 = arith.extui %12 : vector<512x256xi1> to vector<512x256xi32>
    %14 = arith.sitofp %13 : vector<512x256xi32> to vector<512x256xf32>
    %15 = arith.truncf %14 : vector<512x256xf32> to vector<512x256xbf16>
    %16 = vector.broadcast %8 : vector<512x1xi32> to vector<512x128xi32>
    %17 = arith.cmpi eq, %16, %10 : vector<512x128xi32>
    %18 = arith.extui %17 : vector<512x128xi1> to vector<512x128xi32>
    %19 = arith.sitofp %18 : vector<512x128xi32> to vector<512x128xf32>
    %20 = arith.truncf %19 : vector<512x128xf32> to vector<512x128xbf16>
    %21 = tpu.concatenate %15, %20 in 1 : vector<512x256xbf16>, vector<512x128xbf16> -> vector<512x384xbf16>
    %c0_3 = arith.constant 0 : index
    %c0_4 = arith.constant 0 : index
    %22 = vector.load %arg4[%c0_3, %c0_4] : memref<384x128xbf16, #tpu.memory_space<vmem>>, vector<384x128xbf16>
    %cst = arith.constant dense<0.000000e+00> : vector<512x128xf32>
    %23 = tpu.matmul %21, %22, %cst {dimension_numbers = #tpu.dot_dimension_numbers<[1], [0], [0], [1], [0, 0, 1, 1], [], []>} : vector<512x384xbf16>, vector<384x128xbf16>, vector<512x128xf32> -> vector<512x128xf32>
    %c0_5 = arith.constant 0 : index
    %c0_6 = arith.constant 0 : index
    %24 = vector.load %arg5[%c0_5, %c0_6] : memref<1x128xf32, #tpu.memory_space<vmem>>, vector<1x128xf32>
    %25 = vector.broadcast %24 : vector<1x128xf32> to vector<512x128xf32>
    %26 = arith.addf %23, %25 : vector<512x128xf32>
    %cst_7 = arith.constant 0.000000e+00 : f32
    %27 = vector.broadcast %cst_7 : f32 to vector<512x128xf32>
    %28 = arith.maximumf %26, %27 : vector<512x128xf32>
    %c0_8 = arith.constant 0 : index
    %c0_9 = arith.constant 0 : index
    %29 = vector.load %arg12[%c0_8, %c0_9] : memref<2x128xf32, #tpu.memory_space<vmem>>, vector<2x128xf32>
    %30 = vector.shape_cast %28 : vector<512x128xf32> to vector<2x256x128xf32>
    %cst_10 = arith.constant dense<0.000000e+00> : vector<2x128xf32>
    %31 = vector.multi_reduction <add>, %30, %cst_10 [1] : vector<2x256x128xf32> to vector<2x128xf32>
    %32 = arith.addf %29, %31 : vector<2x128xf32>
    %c0_11 = arith.constant 0 : index
    %c0_12 = arith.constant 0 : index
    %33 = vector.load %arg12[%c0_11, %c0_12] : memref<2x128xf32, #tpu.memory_space<vmem>>, vector<2x128xf32>
    tpu.vector_store %arg12[%c0_11, %c0_12], %32 {strides = array<i32>} : memref<2x128xf32, #tpu.memory_space<vmem>>, vector<2x128xf32>,
    %c0_i32_13 = arith.constant 0 : i32
    %34 = arith.cmpi eq, %arg1, %c0_i32_13 : i32
    %35 = arith.extui %34 : i1 to i32
    %c0_i32_14 = arith.constant 0 : i32
    %36 = arith.cmpi ne, %35, %c0_i32_14 : i32
    scf.if %36 {
      %c0_15 = arith.constant 0 : index
      %c0_16 = arith.constant 0 : index
      %37 = vector.load %arg12[%c0_15, %c0_16] : memref<2x128xf32, #tpu.memory_space<vmem>>, vector<2x128xf32>
      %c0_17 = arith.constant 0 : index
      %c0_18 = arith.constant 0 : index
      %38 = vector.load %arg6[%c0_17, %c0_18] : memref<128x128xf32, #tpu.memory_space<vmem>>, vector<128x128xf32>
      %cst_19 = arith.constant dense<0.000000e+00> : vector<2x128xf32>
      %39 = tpu.matmul %37, %38, %cst_19 {dimension_numbers = #tpu.dot_dimension_numbers<[1], [0], [0], [1], [0, 0, 1, 1], [], []>} : vector<2x128xf32>, vector<128x128xf32>, vector<2x128xf32> -> vector<2x128xf32>
      %c0_20 = arith.constant 0 : index
      %c0_21 = arith.constant 0 : index
      %40 = vector.load %arg3[%c0_20, %c0_21] : memref<2x128xf32, #tpu.memory_space<vmem>>, vector<2x128xf32>
      %41 = arith.addf %39, %40 : vector<2x128xf32>
      %cst_22 = arith.constant 0.000000e+00 : f32
      %42 = vector.broadcast %cst_22 : f32 to vector<2x128xf32>
      %43 = arith.cmpf ogt, %41, %42 : vector<2x128xf32>
      %cst_23 = arith.constant 0.000000e+00 : f32
      %44 = vector.broadcast %cst_23 : f32 to vector<2x128xf32>
      %45 = arith.minimumf %41, %44 : vector<2x128xf32>
      %46 = math.exp %45 : vector<2x128xf32>
      %cst_24 = arith.constant 1.000000e+00 : f32
      %47 = vector.broadcast %cst_24 : f32 to vector<2x128xf32>
      %48 = arith.subf %46, %47 : vector<2x128xf32>
      %49 = arith.select %43, %41, %48 : vector<2x128xi1>, vector<2x128xf32>
      %c0_25 = arith.constant 0 : index
      %c0_26 = arith.constant 0 : index
      %50 = vector.load %arg7[%c0_25, %c0_26] : memref<128x128xf32, #tpu.memory_space<vmem>>, vector<128x128xf32>
      %cst_27 = arith.constant dense<0.000000e+00> : vector<2x128xf32>
      %51 = tpu.matmul %49, %50, %cst_27 {dimension_numbers = #tpu.dot_dimension_numbers<[1], [0], [0], [1], [0, 0, 1, 1], [], []>} : vector<2x128xf32>, vector<128x128xf32>, vector<2x128xf32> -> vector<2x128xf32>
      %c0_28 = arith.constant 0 : index
      %c0_29 = arith.constant 0 : index
      %52 = vector.load %arg8[%c0_28, %c0_29] : memref<1x128xf32, #tpu.memory_space<vmem>>, vector<1x128xf32>
      %53 = vector.broadcast %52 : vector<1x128xf32> to vector<2x128xf32>
      %54 = arith.addf %51, %53 : vector<2x128xf32>
      %cst_30 = arith.constant dense<0.000000e+00> : vector<2xf32>
      %55 = vector.multi_reduction <add>, %54, %cst_30 [1] : vector<2x128xf32> to vector<2xf32>
      %56 = vector.shape_cast %55 : vector<2xf32> to vector<2x1xf32>
      %cst_31 = arith.constant 1.280000e+02 : f32
      %57 = vector.broadcast %cst_31 : f32 to vector<2x1xf32>
      %58 = arith.divf %56, %57 : vector<2x1xf32>
      %59 = vector.broadcast %58 : vector<2x1xf32> to vector<2x128xf32>
      %60 = arith.subf %54, %59 : vector<2x128xf32>
      %61 = arith.mulf %60, %60 : vector<2x128xf32>
      %cst_32 = arith.constant dense<0.000000e+00> : vector<2xf32>
      %62 = vector.multi_reduction <add>, %61, %cst_32 [1] : vector<2x128xf32> to vector<2xf32>
      %63 = vector.shape_cast %62 : vector<2xf32> to vector<2x1xf32>
      %cst_33 = arith.constant 1.280000e+02 : f32
      %64 = vector.broadcast %cst_33 : f32 to vector<2x1xf32>
      %65 = arith.divf %63, %64 : vector<2x1xf32>
      %cst_34 = arith.constant 9.99999974E-6 : f32
      %66 = vector.broadcast %cst_34 : f32 to vector<2x1xf32>
      %67 = arith.addf %65, %66 : vector<2x1xf32>
      %68 = math.rsqrt %67 : vector<2x1xf32>
      %69 = vector.broadcast %58 : vector<2x1xf32> to vector<2x128xf32>
      %70 = arith.subf %54, %69 : vector<2x128xf32>
      %71 = vector.broadcast %68 : vector<2x1xf32> to vector<2x128xf32>
      %72 = arith.mulf %70, %71 : vector<2x128xf32>
      %c0_35 = arith.constant 0 : index
      %c0_36 = arith.constant 0 : index
      %73 = vector.load %arg9[%c0_35, %c0_36] : memref<1x128xf32, #tpu.memory_space<vmem>>, vector<1x128xf32>
      %74 = vector.broadcast %73 : vector<1x128xf32> to vector<2x128xf32>
      %75 = arith.mulf %72, %74 : vector<2x128xf32>
      %c0_37 = arith.constant 0 : index
      %c0_38 = arith.constant 0 : index
      %76 = vector.load %arg10[%c0_37, %c0_38] : memref<1x128xf32, #tpu.memory_space<vmem>>, vector<1x128xf32>
      %77 = vector.broadcast %76 : vector<1x128xf32> to vector<2x128xf32>
      %78 = arith.addf %75, %77 : vector<2x128xf32>
      %c0_39 = arith.constant 0 : index
      %c0_40 = arith.constant 0 : index
      %79 = vector.load %arg11[%c0_39, %c0_40] : memref<2x128xf32, #tpu.memory_space<vmem>>, vector<2x128xf32>
      tpu.vector_store %arg11[%c0_39, %c0_40], %78 {strides = array<i32>} : memref<2x128xf32, #tpu.memory_space<vmem>>, vector<2x128xf32>,
    } else {
    }
    return
  }
  func.func @transform_0(%arg0: i32, %arg1: i32) -> (i32, i32, i32) {
    %c0_i32 = arith.constant 0 : i32
    %c0_i32_0 = arith.constant 0 : i32
    return %arg0, %arg1, %c0_i32 : i32, i32, i32
  }
  func.func @transform_1(%arg0: i32, %arg1: i32) -> (i32, i32) {
    %c0_i32 = arith.constant 0 : i32
    %c0_i32_0 = arith.constant 0 : i32
    return %arg0, %c0_i32 : i32, i32
  }
  func.func @transform_2(%arg0: i32, %arg1: i32) -> (i32, i32) {
    %c0_i32 = arith.constant 0 : i32
    %c0_i32_0 = arith.constant 0 : i32
    %c0_i32_1 = arith.constant 0 : i32
    return %c0_i32, %c0_i32_0 : i32, i32
  }
  func.func @transform_3(%arg0: i32, %arg1: i32) -> (i32, i32) {
    %c0_i32 = arith.constant 0 : i32
    %c0_i32_0 = arith.constant 0 : i32
    %c0_i32_1 = arith.constant 0 : i32
    return %c0_i32, %c0_i32_0 : i32, i32
  }
  func.func @transform_4(%arg0: i32, %arg1: i32) -> (i32, i32) {
    %c0_i32 = arith.constant 0 : i32
    %c0_i32_0 = arith.constant 0 : i32
    %c0_i32_1 = arith.constant 0 : i32
    return %c0_i32, %c0_i32_0 : i32, i32
  }
  func.func @transform_5(%arg0: i32, %arg1: i32) -> (i32, i32) {
    %c0_i32 = arith.constant 0 : i32
    %c0_i32_0 = arith.constant 0 : i32
    %c0_i32_1 = arith.constant 0 : i32
    return %c0_i32, %c0_i32_0 : i32, i32
  }
  func.func @transform_6(%arg0: i32, %arg1: i32) -> (i32, i32) {
    %c0_i32 = arith.constant 0 : i32
    %c0_i32_0 = arith.constant 0 : i32
    %c0_i32_1 = arith.constant 0 : i32
    return %c0_i32, %c0_i32_0 : i32, i32
  }
  func.func @transform_7(%arg0: i32, %arg1: i32) -> (i32, i32) {
    %c0_i32 = arith.constant 0 : i32
    %c0_i32_0 = arith.constant 0 : i32
    %c0_i32_1 = arith.constant 0 : i32
    return %c0_i32, %c0_i32_0 : i32, i32
  }
  func.func @transform_8(%arg0: i32, %arg1: i32) -> (i32, i32) {
    %c0_i32 = arith.constant 0 : i32
    %c0_i32_0 = arith.constant 0 : i32
    %c0_i32_1 = arith.constant 0 : i32
    return %c0_i32, %c0_i32_0 : i32, i32
  }
  func.func @transform_9(%arg0: i32, %arg1: i32) -> (i32, i32) {
    %c0_i32 = arith.constant 0 : i32
    %c0_i32_0 = arith.constant 0 : i32
    return %arg0, %c0_i32 : i32, i32
  }
}

</mosaic_0001>

<bundles_post_ra>
// kernel: tpu_custom_call.1
= control target key start
LH: loop header
LB: loop body
LE: loop exit
PB: predicated region body
PF: predicated region fallthrough
CT: control target
= control target key end

     0   :  { %v3236_v3 = vmov 0   ;;  %s4630_s0 = inlined_call_operand.vmem [shape: s32[2,256,1], index: 0, kind: input, shape index: {}]   ;;  %s4631_s1 = inlined_call_operand.vmem [shape: f32[2,128], index: 1, kind: input, shape index: {}]   ;;  %s4632_s2 = inlined_call_operand.vmem [shape: bf16[384,128], index: 2, kind: input, shape index: {}]   ;;  %s4633_s3 = inlined_call_operand.vmem [shape: f32[1,128], index: 3, kind: input, shape index: {}]   ;;  %s4634_s4 = inlined_call_operand.vmem [shape: f32[128,128], index: 4, kind: input, shape index: {}]   ;;  %s4635_s5 = inlined_call_operand.vmem [shape: f32[128,128], index: 5, kind: input, shape index: {}]   ;;  %s4636_s6 = inlined_call_operand.vmem [shape: f32[1,128], index: 6, kind: input, shape index: {}]   ;;  %s4637_s7 = inlined_call_operand.vmem [shape: f32[1,128], index: 7, kind: input, shape index: {}]   ;;  %s4638_s8 = inlined_call_operand.vmem [shape: f32[1,128], index: 8, kind: input, shape index: {}]   ;;  %s4639_s9 = inlined_call_operand.hbm [shape: f32[2,128], index: 9, kind: output, shape index: {}]  }
   0x1   :  { %v3295_v0 = vld [vmem:[%s4630_s0 + $0x10] sm:$0xff]  ;;  %v3300_v1 = vld [vmem:[%s4630_s0] sm:$0xff]  ;;  %v3305_v2 = vld [vmem:[%s4630_s0 + $0x18] sm:$0xff]  ;;  %3173 = vset.pattern.permute.xlu1 %v3236_v3  ;;  %3172 = vset.pattern.permute.xlu0 %v3236_v3 }
   0x2   :  { %v105_v4 = vand.u32 255, %v3295_v0  ;;  %v103_v5 = vand.u32 255, %v3300_v1  ;;  %v3314_v6 = vld [vmem:[%s4630_s0 + $0x8] sm:$0xff]  ;;  %1489 = vmatprep.subr.bf16.mxu0 %v3236_v3  ;;  %3134 = vmatprep.subr.bf16.mxu1 %v3236_v3  ;;  %v106_v7 = vand.u32 255, %v3305_v2  ;;  %v3328_v10 = vld [vmem:[%s4630_s0 + $0x20] sm:$0xff]  ;;  %v3335_v13 = vld [vmem:[%s4630_s0 + $0x38] sm:$0xff] }
   0x3   :  { %v104_v8 = vand.u32 255, %v3314_v6  ;;  %v3323_v9 = vld [vmem:[%s4630_s0 + $0x28] sm:$0xff]  ;;  %v107_v12 = vand.u32 255, %v3328_v10  ;;  %v3340_v14 = vld [vmem:[%s4630_s0 + $0x30] sm:$0xff]  ;;  %v110_v15 = vand.u32 255, %v3335_v13  ;;  %v3352_v18 = vld [vmem:[%s4630_s0 + $0x40] sm:$0xff] }
   0x4   :  { %241 = vperm.xlu1 %3173, %v105_v4   ;;  %235 = vperm.xlu0 %3172, %v103_v5   ;;  %v108_v11 = vand.u32 255, %v3323_v9  ;;  %v109_v16 = vand.u32 255, %v3340_v14  ;;  %v3347_v17 = vld [vmem:[%s4630_s0 + $0x48] sm:$0xff]  ;;  %v3174_v19 = vld [vmem:[%s4632_s2] sm:$0xff]   ;;  %v111_v21 = vand.u32 255, %v3352_v18  ;;  %v3362_v22 = vld [vmem:[%s4630_s0 + $0x58] sm:$0xff] }
   0x5   :  { %v112_v20 = vand.u32 255, %v3347_v17  ;;  %v3367_v23 = vld [vmem:[%s4630_s0 + $0x50] sm:$0xff]  ;;  %1490 = vmatpush1.bf16.msra.mxu0 %v3174_v19  ;;  %3150 = vmatpush1.bf16.msra.mxu1 %v3174_v19  ;;  %v3175_v24 = vld [vmem:[%s4632_s2 + $0x8] sm:$0xff]   ;;  %v114_v25 = vand.u32 255, %v3362_v22  ;;  %v3384_v28 = vld [vmem:[%s4630_s0 + $0x60] sm:$0xff] }
   0x6   :  { %1491 = vmatprep.subr.bf16.mxu0 %v3236_v3  ;;  %3135 = vmatprep.subr.bf16.mxu1 %v3236_v3  ;;  %v113_v26 = vand.u32 255, %v3367_v23  ;;  %v3379_v27 = vld [vmem:[%s4630_s0 + $0x68] sm:$0xff]  ;;  %v3176_v29 = vld [vmem:[%s4632_s2 + $0x10] sm:$0xff]   ;;  %v115_v31 = vand.u32 255, %v3384_v28  ;;  %v3396_v32 = vld [vmem:[%s4630_s0 + $0x78] sm:$0xff] }
   0x7   :  { %v116_v30 = vand.u32 255, %v3379_v27  ;;  %v3401_v33 = vld [vmem:[%s4630_s0 + $0x70] sm:$0xff]  ;;  %v3177_v34 = vld [vmem:[%s4632_s2 + $0x18] sm:$0xff]   ;;  %v118_v35 = vand.u32 255, %v3396_v32  ;;  %v3413_v37 = vld [vmem:[%s4630_s0 + $0x88] sm:$0xff] }
   0x8   :  { %244 = vperm.xlu1 %3173, %v106_v7   ;;  %238 = vperm.xlu0 %3172, %v104_v8   ;;  %v117_v36 = vand.u32 255, %v3401_v33  ;;  %v3418_v38 = vld [vmem:[%s4630_s0 + $0x80] sm:$0xff]  ;;  %v120_v40 = vand.u32 255, %v3413_v37  ;;  %v94_v42 = vld [vmem:[%s4630_s0 + $0x1b8] sm:$0xff]  ;;  %v93_v43 = vld [vmem:[%s4630_s0 + $0x1b0] sm:$0xff] }
   0x9   :  { %1492 = vmatpush1.bf16.msra.mxu0 %v3175_v24  ;;  %3151 = vmatpush1.bf16.msra.mxu1 %v3175_v24  ;;  %v3178_v39 = vld [vmem:[%s4632_s2 + $0x20] sm:$0xff]   ;;  %v119_v41 = vand.u32 255, %v3418_v38  ;;  %v3179_v44 = vld [vmem:[%s4632_s2 + $0x28] sm:$0xff]   ;;  %v158_v45 = vand.u32 255, %v94_v42  ;;  %v157_v46 = vand.u32 255, %v93_v43  ;;  %v3441_v47 = vld [vmem:[%s4630_s0 + $0x98] sm:$0xff] }
   0xa   :  { %1493 = vmatprep.subr.bf16.mxu0 %v3236_v3  ;;  %3136 = vmatprep.subr.bf16.mxu1 %v3236_v3  ;;  %v3446_v48 = vld [vmem:[%s4630_s0 + $0x90] sm:$0xff]  ;;  %v122_v50 = vand.u32 255, %v3441_v47  ;;  %v96_v51 = vld [vmem:[%s4630_s0 + $0x1c8] sm:$0xff]  ;;  %v95_v53 = vld [vmem:[%s4630_s0 + $0x1c0] sm:$0xff] }
   0xb   :  { %v3180_v49 = vld [vmem:[%s4632_s2 + $0x30] sm:$0xff]   ;;  %v121_v52 = vand.u32 255, %v3446_v48  ;;  %v3181_v54 = vld [vmem:[%s4632_s2 + $0x38] sm:$0xff]   ;;  %v160_v55 = vand.u32 255, %v96_v51  ;;  %v159_v56 = vand.u32 255, %v95_v53  ;;  %v3469_v57 = vld [vmem:[%s4630_s0 + $0xa8] sm:$0xff] }
   0xc   :  { %250 = vperm.xlu1 %3173, %v108_v11   ;;  %247 = vperm.xlu0 %3172, %v107_v12   ;;  %v3474_v58 = vld [vmem:[%s4630_s0 + $0xa0] sm:$0xff] }
   0xd   :  { %1494 = vmatpush1.bf16.msra.mxu0 %v3176_v29  ;;  %3152 = vmatpush1.bf16.msra.mxu1 %v3176_v29  ;;  %v3182_v59 = vld [vmem:[%s4632_s2 + $0x40] sm:$0xff]  }
   0xe   :  { %1495 = vmatprep.subr.bf16.mxu0 %v3236_v3  ;;  %3137 = vmatprep.subr.bf16.mxu1 %v3236_v3 }
  0x10   :  { %256 = vperm.xlu1 %3173, %v110_v15   ;;  %253 = vperm.xlu0 %3172, %v109_v16  }
  0x11   :  { %1496 = vmatpush1.bf16.msra.mxu0 %v3177_v34  ;;  %3153 = vmatpush1.bf16.msra.mxu1 %v3177_v34 }
  0x12   :  { %1497 = vmatprep.subr.bf16.mxu0 %v3236_v3  ;;  %3138 = vmatprep.subr.bf16.mxu1 %v3236_v3 }
  0x14   :  { %262 = vperm.xlu1 %3173, %v112_v20   ;;  %259 = vperm.xlu0 %3172, %v111_v21  }
  0x15   :  { %1498 = vmatpush1.bf16.msra.mxu0 %v3178_v39  ;;  %3154 = vmatpush1.bf16.msra.mxu1 %v3178_v39 }
  0x16   :  { %1499 = vmatprep.subr.bf16.mxu0 %v3236_v3  ;;  %3139 = vmatprep.subr.bf16.mxu1 %v3236_v3 }
  0x18   :  { %268 = vperm.xlu1 %3173, %v114_v25   ;;  %265 = vperm.xlu0 %3172, %v113_v26  }
  0x19   :  { %1500 = vmatpush1.bf16.msra.mxu0 %v3179_v44  ;;  %3155 = vmatpush1.bf16.msra.mxu1 %v3179_v44 }
  0x1a   :  { %1501 = vmatprep.subr.bf16.mxu0 %v3236_v3  ;;  %3140 = vmatprep.subr.bf16.mxu1 %v3236_v3 }
  0x1c   :  { %274 = vperm.xlu1 %3173, %v116_v30   ;;  %271 = vperm.xlu0 %3172, %v115_v31  }
  0x1d   :  { %1502 = vmatpush1.bf16.msra.mxu0 %v3180_v49  ;;  %3156 = vmatpush1.bf16.msra.mxu1 %v3180_v49 }
  0x1e   :  { %1503 = vmatprep.subr.bf16.mxu0 %v3236_v3  ;;  %3141 = vmatprep.subr.bf16.mxu1 %v3236_v3 }
  0x20   :  { %280 = vperm.xlu1 %3173, %v118_v35   ;;  %277 = vperm.xlu0 %3172, %v117_v36  }
  0x21   :  { %1504 = vmatpush1.bf16.msra.mxu0 %v3181_v54  ;;  %3157 = vmatpush1.bf16.msra.mxu1 %v3181_v54 }
  0x22   :  { %1505 = vmatprep.subr.bf16.mxu0 %v3236_v3  ;;  %3142 = vmatprep.subr.bf16.mxu1 %v3236_v3 }
  0x24   :  { %286 = vperm.xlu1 %3173, %v120_v40   ;;  %283 = vperm.xlu0 %3172, %v119_v41  }
  0x28   :  { %400 = vperm.xlu1 %3173, %v158_v45   ;;  %397 = vperm.xlu0 %3172, %v157_v46  }
  0x2c   :  { %292 = vperm.xlu1 %3173, %v122_v50   ;;  %289 = vperm.xlu0 %3172, %v121_v52  }
  0x2d   :  { %14 = vsyncpa [#allocation4], 0  ;;  %v124_v60 = vand.u32 255, %v3469_v57  ;;  %v123_v61 = vand.u32 255, %v3474_v58  ;;  %v98_v62 = vld [vmem:[%s4630_s0 + $0x1d8] sm:$0xff]  ;;  %v97_v63 = vld [vmem:[%s4630_s0 + $0x1d0] sm:$0xff]  ;;  %1506 = vmatpush1.bf16.msra.mxu0 %v3182_v59  ;;  %3158 = vmatpush1.bf16.msra.mxu1 %v3182_v59 }
  0x2e   :  { %v3183_v4 = vld [vmem:[%s4632_s2 + $0x48] sm:$0xff]   ;;  %1507 = vmatprep.subr.bf16.mxu0 %v3236_v3  ;;  %3143 = vmatprep.subr.bf16.mxu1 %v3236_v3  ;;  %v162_v5 = vand.u32 255, %v98_v62  ;;  %v161_v7 = vand.u32 255, %v97_v63  ;;  %v3497_v8 = vld [vmem:[%s4630_s0 + $0xb8] sm:$0xff]  ;;  %v3502_v11 = vld [vmem:[%s4630_s0 + $0xb0] sm:$0xff]  ;;  %v167_v51 = vshra.s32 %v3300_v1, 8 }
  0x2f   :  { %v3184_v12 = vld [vmem:[%s4632_s2 + $0x50] sm:$0xff]   ;;  %v126_v15 = vand.u32 255, %v3497_v8  ;;  %v125_v16 = vand.u32 255, %v3502_v11  ;;  %v100_v19 = vld [vmem:[%s4630_s0 + $0x1e8] sm:$0xff]  ;;  %v99_v20 = vld [vmem:[%s4630_s0 + $0x1e0] sm:$0xff]  ;;  %v168_v52 = vshra.s32 %v3314_v6, 8 }
  0x30   :  { %406 = vperm.xlu1 %3173, %v160_v55   ;;  %403 = vperm.xlu0 %3172, %v159_v56   ;;  %v3185_v21 = vld [vmem:[%s4632_s2 + $0x58] sm:$0xff]   ;;  %v164_v24 = vand.u32 255, %v100_v19  ;;  %v163_v25 = vand.u32 255, %v99_v20  ;;  %v3525_v26 = vld [vmem:[%s4630_s0 + $0xc8] sm:$0xff]  ;;  %v3530_v29 = vld [vmem:[%s4630_s0 + $0xc0] sm:$0xff]  ;;  %v169_v53 = vshra.s32 %v3295_v0, 8  ;;  %v231_v19 = vlaneseq }
  0x31   :  { %1508 = vmatpush1.bf16.msra.mxu0 %v3183_v4  ;;  %3159 = vmatpush1.bf16.msra.mxu1 %v3183_v4  ;;  %v3186_v30 = vld [vmem:[%s4632_s2 + $0x60] sm:$0xff]   ;;  %v128_v31 = vand.u32 255, %v3525_v26  ;;  %v127_v34 = vand.u32 255, %v3530_v29  ;;  %v102_v35 = vld [vmem:[%s4630_s0 + $0x1f8] sm:$0xff]  ;;  %v101_v36 = vld [vmem:[%s4630_s0 + $0x1f0] sm:$0xff]  ;;  %v171_v55 = vshra.s32 %v3328_v10, 8 }
  0x32   :  { %1509 = vmatprep.subr.bf16.mxu0 %v3236_v3  ;;  %3144 = vmatprep.subr.bf16.mxu1 %v3236_v3  ;;  %v3187_v39 = vld [vmem:[%s4632_s2 + $0x68] sm:$0xff]   ;;  %v166_v40 = vand.u32 255, %v102_v35  ;;  %v165_v41 = vand.u32 255, %v101_v36  ;;  %v3553_v42 = vld [vmem:[%s4630_s0 + $0xd8] sm:$0xff]  ;;  %v3558_v43 = vld [vmem:[%s4630_s0 + $0xd0] sm:$0xff]  ;;  %v174_v56 = vshra.s32 %v3335_v13, 8 }
  0x33   :  { %v3188_v44 = vld [vmem:[%s4632_s2 + $0x70] sm:$0xff]   ;;  %v130_v45 = vand.u32 255, %v3553_v42  ;;  %v129_v46 = vand.u32 255, %v3558_v43  ;;  %v3189_v49 = vld [vmem:[%s4632_s2 + $0x78] sm:$0xff]   ;;  %v3575_v50 = vld [vmem:[%s4632_s2 + $0x80] sm:$0xff]   ;;  %v173_v59 = vshra.s32 %v3340_v14, 8 }
  0x34   :  { %298 = vperm.xlu1 %3173, %v124_v60   ;;  %295 = vperm.xlu0 %3172, %v123_v61   ;;  %v3585_v54 = vld [vmem:[%s4630_s0 + $0xe8] sm:$0xff]  ;;  %v3590_v1 = vld [vmem:[%s4630_s0 + $0xe0] sm:$0xff]  ;;  %v3601_v60 = vld [vmem:[%s4630_s0 + $0xf8] sm:$0xff]  ;;  %v176_v13 = vshra.s32 %v3347_v17, 8  ;;  %v175_v14 = vshra.s32 %v3352_v18, 8  ;;  %v178_v62 = vshra.s32 %v3362_v22, 8 }
  0x35   :  { %1510 = vmatpush1.bf16.msra.mxu0 %v3184_v12  ;;  %3160 = vmatpush1.bf16.msra.mxu1 %v3184_v12  ;;  %v132_v6 = vand.u32 255, %v3585_v54  ;;  %v131_v0 = vand.u32 255, %v3590_v1  ;;  %v3606_v61 = vld [vmem:[%s4630_s0 + $0xf0] sm:$0xff]  ;;  %v177_v63 = vshra.s32 %v3367_v23, 8  ;;  %v3617_v4 = vld [vmem:[%s4630_s0 + $0x108] sm:$0xff]  ;;  %v180_v22 = vshra.s32 %v3379_v27, 8 }
  0x36   :  { %1511 = vmatprep.subr.bf16.mxu0 %v3236_v3  ;;  %3145 = vmatprep.subr.bf16.mxu1 %v3236_v3  ;;  %v133_v10 = vand.u32 255, %v3606_v61  ;;  %v136_v17 = vand.u32 255, %v3617_v4  ;;  %v179_v23 = vshra.s32 %v3384_v28, 8  ;;  %v181_v12 = vshra.s32 %v3401_v33, 8  ;;  %s3241_s11 = smov [#allocation3]  }
  0x37   :  { %v183_v33 = vshra.s32 %v3418_v38, 8  ;;  %v186_v20 = vshra.s32 %v3441_v47, 8  ;;  %v188_v36 = vshra.s32 %v3469_v57, 8  ;;  %v189_v57 = vshra.s32 %v3502_v11, 8  ;;  %s2441_s12 = sshll.u32 %s3241_s11, 4  ;;  %s2442_s12 = int_to_ptr.vmem [resolvable:$true] %s2441_s12 }
  0x38   :  { %412 = vperm.xlu1 %3173, %v162_v5   ;;  %409 = vperm.xlu0 %3172, %v161_v7   ;;  %v3622_v5 = vld [vmem:[%s4630_s0 + $0x100] sm:$0xff]  ;;  %v182_v7 = vshra.s32 %v3396_v32, 8  ;;  %v184_v32 = vshra.s32 %v3413_v37, 8  ;;  %s3212_s13 = scalar_lea.vmem %s2442_s12, 32  ;;  %p3217_p1 = scmp.lt.s32.totalorder %s2442_s12, %s2442_s12 }
  0x39   :  { %1512 = vmatpush1.bf16.msra.mxu0 %v3185_v21  ;;  %3161 = vmatpush1.bf16.msra.mxu1 %v3185_v21  ;;  %v135_v18 = vand.u32 255, %v3622_v5  ;;  %v185_v21 = vshra.s32 %v3446_v48, 8  ;;  %v3656_v37 = vld [vmem:[%s4630_s0 + $0x120] sm:$0xff]  ;;  %p3213_p0 = scmp.ne.s32.totalorder %s2442_s12, %s3212_s13  ;;  %p3218_p2 = scmp.lt.s32.totalorder %s3212_s13, %s3212_s13 }
  0x3a   :  { %1513 = vmatprep.subr.bf16.mxu0 %v3236_v3  ;;  %3146 = vmatprep.subr.bf16.mxu1 %v3236_v3  ;;  %v139_v48 = vand.u32 255, %v3656_v37 }
  0x3b   :  { %p3219_p3 = por %p3218_p2, %p3217_p1 }
  0x3c   :  { %304 = vperm.xlu1 %3173, %v126_v15   ;;  %301 = vperm.xlu0 %3172, %v125_v16   ;;  %v3633_v15 = vld [vmem:[%s4630_s0 + $0x118] sm:$0xff]  ;;  %v3638_v16 = vld [vmem:[%s4630_s0 + $0x110] sm:$0xff] }
  0x3d   :  { %1514 = vmatpush1.bf16.msra.mxu0 %v3186_v30  ;;  %3162 = vmatpush1.bf16.msra.mxu1 %v3186_v30  ;;  %v138_v27 = vand.u32 255, %v3633_v15  ;;  %v137_v28 = vand.u32 255, %v3638_v16  ;;  %p3220_p4 = pnand %p3219_p3, %p3213_p0 }
  0x3e   :  { %1515 = vmatprep.subr.bf16.mxu0 %v3236_v3  ;;  %3147 = vmatprep.subr.bf16.mxu1 %v3236_v3 }
  0x40   :  { %418 = vperm.xlu1 %3173, %v164_v24   ;;  %415 = vperm.xlu0 %3172, %v163_v25   ;;  %v3646_v24 = vand.u32 127, %v231_v19  ;;  %v3651_v25 = vld [vmem:[%s4630_s0 + $0x128] sm:$0xff] }
  0x41   :  { %1516 = vmatpush1.bf16.msra.mxu0 %v3187_v39  ;;  %3163 = vmatpush1.bf16.msra.mxu1 %v3187_v39  ;;  %v140_v47 = vand.u32 255, %v3651_v25  ;;  %v187_v39 = vshra.s32 %v3474_v58, 8  ;;  %v3679_v58 = vld [vmem:[%s4630_s0 + $0x138] sm:$0xff] }
  0x42   :  { %1517 = vmatprep.subr.bf16.mxu0 %v3236_v3  ;;  %3148 = vmatprep.subr.bf16.mxu1 %v3236_v3 }
  0x44   :  { %310 = vperm.xlu1 %3173, %v128_v31   ;;  %307 = vperm.xlu0 %3172, %v127_v34   ;;  %v3661_v31 = vadd.s32 128, %v3646_v24 }
  0x45   :  { %1518 = vmatpush1.bf16.msra.mxu0 %v3188_v44  ;;  %3164 = vmatpush1.bf16.msra.mxu1 %v3188_v44 }
  0x46   :  { %1519 = vmatprep.subr.bf16.mxu0 %v3236_v3  ;;  %3149 = vmatprep.subr.bf16.mxu1 %v3236_v3  ;;  %v170_v3 = vshra.s32 %v3305_v2, 8  ;;  %v172_v2 = vshra.s32 %v3323_v9, 8  ;;  %v134_v9 = vand.u32 255, %v3601_v60 }
  0x48   :  { %424 = vperm.xlu1 %3173, %v166_v40   ;;  %421 = vperm.xlu0 %3172, %v165_v41   ;;  %v3237_v40 = vmov 1.0|1.0  }
  0x49   :  { %1520 = vmatpush1.bf16.msra.mxu0 %v3189_v49  ;;  %3165 = vmatpush1.bf16.msra.mxu1 %v3189_v49 }
  0x4a   :  { %2936 = vmatprep.subr.bf16.mxu1 %v3575_v50 }
  0x4c   :  { %316 = vperm.xlu1 %3173, %v130_v45   ;;  %313 = vperm.xlu0 %3172, %v129_v46   ;;  %v190_v45 = vshra.s32 %v3497_v8, 8  ;;  %v3684_v46 = vld [vmem:[%s4630_s0 + $0x130] sm:$0xff]  ;;  %v142_v8 = vand.u32 255, %v3679_v58 }
  0x4d   :  { %v141_v11 = vand.u32 255, %v3684_v46 }
  0x50   :  { %878 = vperm.xlu1 %3173, %v168_v52   ;;  %875 = vperm.xlu0 %3172, %v167_v51  }
  0x54   :  { %884 = vperm.xlu1 %3173, %v170_v3   ;;  %881 = vperm.xlu0 %3172, %v169_v53   ;;  %v192_v3 = vshra.s32 %v3525_v26, 8  ;;  %v3713_v26 = vld [vmem:[%s4630_s0 + $0x148] sm:$0xff] }
  0x58   :  { %322 = vperm.xlu1 %3173, %v132_v6   ;;  %319 = vperm.xlu0 %3172, %v131_v0   ;;  %v191_v6 = vshra.s32 %v3530_v29, 8  ;;  %v3718_v29 = vld [vmem:[%s4630_s0 + $0x140] sm:$0xff] }
  0x5c   :  { %890 = vperm.xlu1 %3173, %v172_v2   ;;  %887 = vperm.xlu0 %3172, %v171_v55   ;;  %v194_v55 = vshra.s32 %v3553_v42, 8 }
  0x60   :  { %896 = vperm.xlu1 %3173, %v174_v56   ;;  %893 = vperm.xlu0 %3172, %v173_v59   ;;  %v193_v56 = vshra.s32 %v3558_v43, 8  ;;  %v144_v43 = vand.u32 255, %v3713_v26 }
  0x64   :  { %328 = vperm.xlu1 %3173, %v134_v9   ;;  %325 = vperm.xlu0 %3172, %v133_v10   ;;  %v143_v9 = vand.u32 255, %v3718_v29 }
  0x68   :  { %902 = vperm.xlu1 %3173, %v176_v13   ;;  %899 = vperm.xlu0 %3172, %v175_v14   ;;  %v196_v14 = vshra.s32 %v3585_v54, 8  ;;  %v198_v54 = vshra.s32 %v3601_v60, 8 }
  0x6c   :  { %908 = vperm.xlu1 %3173, %v178_v62   ;;  %905 = vperm.xlu0 %3172, %v177_v63   ;;  %v195_v62 = vshra.s32 %v3590_v1, 8  ;;  %v197_v1 = vshra.s32 %v3606_v61, 8 }
  0x70   :  { %334 = vperm.xlu1 %3173, %v136_v17   ;;  %331 = vperm.xlu0 %3172, %v135_v18   ;;  %v3751_v18 = vld [vmem:[%s4630_s0 + $0x158] sm:$0xff] }
  0x74   :  { %914 = vperm.xlu1 %3173, %v180_v22   ;;  %911 = vperm.xlu0 %3172, %v179_v23   ;;  %v3756_v22 = vld [vmem:[%s4630_s0 + $0x150] sm:$0xff]  ;;  %v146_v23 = vand.u32 255, %v3751_v18 }
  0x78   :  { %920 = vperm.xlu1 %3173, %v182_v7   ;;  %917 = vperm.xlu0 %3172, %v181_v12   ;;  %v145_v7 = vand.u32 255, %v3756_v22 }
  0x7c   :  { %340 = vperm.xlu1 %3173, %v138_v27   ;;  %337 = vperm.xlu0 %3172, %v137_v28   ;;  %v3191_v28 = vld [vmem:[%s4632_s2 + $0x88] sm:$0xff]  }
  0x80   :  { %926 = vperm.xlu1 %3173, %v184_v32   ;;  %923 = vperm.xlu0 %3172, %v183_v33   ;;  %v200_v32 = vshra.s32 %v3617_v4, 8  ;;  %v199_v33 = vshra.s32 %v3622_v5, 8  ;;  %v201_v4 = vshra.s32 %v3638_v16, 8  ;;  %v3813_v5 = vld [vmem:[%s4630_s0 + $0x168] sm:$0xff] }
  0x83   :  { %v242_v38 = vpop.permute.xlu1 %241  ;;  %v236_v30 = vpop.permute.xlu0 %235 }
  0x84   :  { %932 = vperm.xlu1 %3173, %v186_v20   ;;  %929 = vperm.xlu0 %3172, %v185_v21   ;;  %vm426_vm0 = vcmp.eq.s32.totalorder %v236_v30, %v3646_v24  ;;  %vm427_vm2 = vcmp.eq.s32.totalorder %v236_v30, %v3661_v31  ;;  %vm431_vm7 = vcmp.eq.s32.totalorder %v242_v38, %v3661_v31  ;;  %v3192_v21 = vld [vmem:[%s4632_s2 + $0x90] sm:$0xff]   ;;  %v3193_v30 = vld [vmem:[%s4632_s2 + $0x98] sm:$0xff]  }
  0x85   :  { %vm430_vm10 = vcmp.eq.s32.totalorder %v242_v38, %v3646_v24 }
  0x87   :  { %v245_v34 = vpop.permute.xlu1 %244  ;;  %v239_v35 = vpop.permute.xlu0 %238 }
  0x88   :  { %vm428_vm1 = vcmp.eq.s32.totalorder %v239_v35, %v3646_v24  ;;  %346 = vperm.xlu1 %3173, %v140_v47   ;;  %343 = vperm.xlu0 %3172, %v139_v48   ;;  %vm429_vm3 = vcmp.eq.s32.totalorder %v239_v35, %v3661_v31  ;;  %vm433_vm5 = vcmp.eq.s32.totalorder %v245_v34, %v3661_v31  ;;  %v148_v47 = vand.u32 255, %v3813_v5 }
  0x89   :  { %vm2668_vm4 = vmpackc.low %vm428_vm1, %vm426_vm0  ;;  %vm432_vm9 = vcmp.eq.s32.totalorder %v245_v34, %v3646_v24 }
  0x8a   :  { %vm2666_vm6 = vmpackc.low %vm429_vm3, %vm427_vm2 }
  0x8b   :  { %2667 = vmatprep.mubr.msk.bf16.mxu0 %vm2666_vm6, %v3237_v40  ;;  %v251_v41 = vpop.permute.xlu1 %250  ;;  %v248_v44 = vpop.permute.xlu0 %247  ;;  %vm2670_vm8 = vmpackc.low %vm433_vm5, %vm431_vm7 }
  0x8c   :  { %2669 = vmatmul.mubr.msk.bf16.vlgmr.msra.gmra.mrb[0].mxu0 %vm2668_vm4, %v3237_v40  ;;  %938 = vperm.xlu1 %3173, %v188_v36   ;;  %vm437_vm11 = vcmp.eq.s32.totalorder %v251_v41, %v3661_v31  ;;  %vm435_vm12 = vcmp.eq.s32.totalorder %v248_v44, %v3661_v31  ;;  %vm2672_vm13 = vmpackc.low %vm432_vm9, %vm430_vm10  ;;  %vm436_vm15 = vcmp.eq.s32.totalorder %v251_v41, %v3646_v24  ;;  %v3194_v36 = vld [vmem:[%s4632_s2 + $0xa0] sm:$0xff]   ;;  %v203_v41 = vshra.s32 %v3656_v37, 8  ;;  %v3195_v37 = vld [vmem:[%s4632_s2 + $0xa8] sm:$0xff]  }
  0x8d   :  { %935 = vperm.xlu0 %3172, %v187_v39   ;;  %2671 = vmatprep.mubr.msk.bf16.mxu0 %vm2670_vm8, %v3237_v40  ;;  %vm2674_vm14 = vmpackc.low %vm437_vm11, %vm435_vm12  ;;  %vm434_vm0 = vcmp.eq.s32.totalorder %v248_v44, %v3646_v24  ;;  %v204_v39 = vshra.s32 %v3651_v25, 8 }
  0x8e   :  { %vm2676_vm3 = vmpackc.low %vm436_vm15, %vm434_vm0 }
  0x8f   :  { %v257_v49 = vpop.permute.xlu1 %256  ;;  %v254_v51 = vpop.permute.xlu0 %253 }
  0x90   :  { %944 = vperm.xlu1 %3173, %v190_v45   ;;  %vm441_vm1 = vcmp.eq.s32.totalorder %v257_v49, %v3661_v31  ;;  %vm439_vm2 = vcmp.eq.s32.totalorder %v254_v51, %v3661_v31  ;;  %vm440_vm5 = vcmp.eq.s32.totalorder %v257_v49, %v3646_v24  ;;  %vm438_vm6 = vcmp.eq.s32.totalorder %v254_v51, %v3646_v24  ;;  %v3883_v49 = vld [vmem:[%s4630_s0 + $0x178] sm:$0xff]  ;;  %v3888_v51 = vld [vmem:[%s4630_s0 + $0x170] sm:$0xff] }
  0x91   :  { %941 = vperm.xlu0 %3172, %v189_v57   ;;  %vm2678_vm4 = vmpackc.low %vm441_vm1, %vm439_vm2  ;;  %v206_v45 = vshra.s32 %v3679_v58, 8  ;;  %v205_v57 = vshra.s32 %v3684_v46, 8 }
  0x92   :  { %vm2680_vm9 = vmpackc.low %vm440_vm5, %vm438_vm6 }
  0x93   :  { %v3692_v52 = vpop.permute.xlu1 %262  ;;  %v3694_v53 = vpop.permute.xlu0 %259 }
  0x94   :  { %2673 = vmatmul.mubr.msk.bf16.gmra.mrb[4].mxu0 %vm2672_vm13, %v3237_v40  ;;  %352 = vperm.xlu1 %3173, %v142_v8   ;;  %vm445_vm7 = vcmp.eq.s32.totalorder %v3692_v52, %v3661_v31  ;;  %vm443_vm8 = vcmp.eq.s32.totalorder %v3694_v53, %v3661_v31  ;;  %vm444_vm11 = vcmp.eq.s32.totalorder %v3692_v52, %v3646_v24  ;;  %v3196_v8 = vld [vmem:[%s4632_s2 + $0xb0] sm:$0xff]   ;;  %v149_v52 = vand.u32 255, %v3888_v51 }
  0x95   :  { %349 = vperm.xlu0 %3172, %v141_v11   ;;  %2675 = vmatprep.mubr.msk.bf16.mxu0 %vm2674_vm14, %v3237_v40  ;;  %vm2682_vm10 = vmpackc.low %vm445_vm7, %vm443_vm8  ;;  %vm442_vm12 = vcmp.eq.s32.totalorder %v3694_v53, %v3646_v24  ;;  %v150_v11 = vand.u32 255, %v3883_v49 }
  0x96   :  { %vm2684_vm5 = vmpackc.low %vm444_vm11, %vm442_vm12 }
  0x97   :  { %v3700_v0 = vpop.permute.xlu1 %268  ;;  %v3702_v2 = vpop.permute.xlu0 %265 }
  0x98   :  { %950 = vperm.xlu1 %3173, %v192_v3   ;;  %vm449_vm2 = vcmp.eq.s32.totalorder %v3700_v0, %v3661_v31  ;;  %vm448_vm7 = vcmp.eq.s32.totalorder %v3700_v0, %v3646_v24  ;;  %vm446_vm8 = vcmp.eq.s32.totalorder %v3702_v2, %v3646_v24  ;;  %v208_v0 = vshra.s32 %v3713_v26, 8 }
  0x99   :  { %947 = vperm.xlu0 %3172, %v191_v6   ;;  %v3197_v6 = vld [vmem:[%s4632_s2 + $0xb8] sm:$0xff]   ;;  %v210_v26 = vshra.s32 %v3751_v18, 8  ;;  %v214_v18 = vshra.s32 %v3883_v49, 8 }
  0x9b   :  { %v3720_v59 = vpop.permute.xlu1 %274  ;;  %v3722_v42 = vpop.permute.xlu0 %271 }
  0x9c   :  { %2677 = vmatmul.mubr.msk.bf16.gmra.mrb[8].mxu0 %vm2676_vm3, %v3237_v40  ;;  %956 = vperm.xlu1 %3173, %v194_v55   ;;  %vm447_vm3 = vcmp.eq.s32.totalorder %v3702_v2, %v3661_v31  ;;  %v207_v2 = vshra.s32 %v3718_v29, 8  ;;  %v209_v29 = vshra.s32 %v3756_v22, 8  ;;  %v213_v22 = vshra.s32 %v3888_v51, 8  ;;  %v3204_v51 = vld [vmem:[%s4630_s0 + $0x1c8] sm:$0xff] }
  0x9d   :  { %953 = vperm.xlu0 %3172, %v193_v56   ;;  %2679 = vmatprep.mubr.msk.bf16.mxu0 %vm2678_vm4, %v3237_v40  ;;  %vm2686_vm6 = vmpackc.low %vm449_vm2, %vm447_vm3  ;;  %vm452_vm3 = vcmp.eq.s32.totalorder %v3720_v59, %v3646_v24 }
  0x9f   :  { %v3728_v10 = vpop.permute.xlu1 %280  ;;  %v3730_v13 = vpop.permute.xlu0 %277 }
  0xa0   :  { %358 = vperm.xlu1 %3173, %v144_v43  }
  0xa1   :  { %355 = vperm.xlu0 %3172, %v143_v9  }
  0xa3   :  { %v3740_v63 = vpop.permute.xlu1 %286  ;;  %v3742_v17 = vpop.permute.xlu0 %283 }
  0xa4   :  { %2681 = vmatmul.mubr.msk.bf16.gmra.mrb[12].mxu0 %vm2680_vm9, %v3237_v40  ;;  %962 = vperm.xlu1 %3173, %v196_v14  }
  0xa5   :  { %959 = vperm.xlu0 %3172, %v195_v62   ;;  %2683 = vmatprep.mubr.msk.bf16.mxu0 %vm2682_vm10, %v3237_v40 }
  0xa7   :  { %v401_v60 = vpop.permute.xlu1 %400  ;;  %v398_v61 = vpop.permute.xlu0 %397 }
  0xa8   :  { %vm536_vm13 = vcmp.eq.s32.totalorder %v401_v60, %v3646_v24  ;;  %vm534_vm14 = vcmp.eq.s32.totalorder %v398_v61, %v3646_v24  ;;  %vm535_vm15 = vcmp.eq.s32.totalorder %v398_v61, %v3661_v31  ;;  %vm537_vm0 = vcmp.eq.s32.totalorder %v401_v60, %v3661_v31  ;;  %968 = vperm.xlu1 %3173, %v198_v54   ;;  %v90_v60 = vld [vmem:[%s4630_s0 + $0x198] sm:$0xff]  ;;  %v89_v61 = vld [vmem:[%s4630_s0 + $0x190] sm:$0xff] }
  0xa9   :  { %965 = vperm.xlu0 %3172, %v197_v1   ;;  %vm2774_vm1 = vmpackc.low %vm537_vm0, %vm535_vm15  ;;  %vm451_vm15 = vcmp.eq.s32.totalorder %v3722_v42, %v3661_v31 }
  0xaa   :  { %2775 = vmatprep.mubr.msk.bf16.mxu1 %vm2774_vm1, %v3237_v40  ;;  %vm2776_vm4 = vmpackc.low %vm536_vm13, %vm534_vm14  ;;  %vm453_vm14 = vcmp.eq.s32.totalorder %v3720_v59, %v3661_v31  ;;  %v3950_v59 = vld [vmem:[%s4630_s0 + $0x188] sm:$0xff] }
  0xab   :  { %v3773_v12 = vpop.permute.xlu1 %292  ;;  %2777 = vmatmul.mubr.msk.bf16.vlgmr.msra.gmra.mrb[0].mxu1 %vm2776_vm4, %v3237_v40  ;;  %v3782_v27 = vpop.permute.xlu0 %289  ;;  %vm2688_vm1 = vmpackc.low %vm448_vm7, %vm446_vm8  ;;  %vm450_vm4 = vcmp.eq.s32.totalorder %v3722_v42, %v3646_v24  ;;  %v3955_v42 = vld [vmem:[%s4630_s0 + $0x180] sm:$0xff] }
  0xac   :  { %2685 = vmatmul.mubr.msk.bf16.gmra.mrb[16].mxu0 %vm2684_vm5, %v3237_v40  ;;  %364 = vperm.xlu1 %3173, %v146_v23   ;;  %vm2690_vm2 = vmpackc.low %vm453_vm14, %vm451_vm15  ;;  %vm456_vm15 = vcmp.eq.s32.totalorder %v3728_v10, %v3646_v24 }
  0xad   :  { %361 = vperm.xlu0 %3172, %v145_v7   ;;  %2687 = vmatprep.mubr.msk.bf16.mxu0 %vm2686_vm6, %v3237_v40 }
  0xae   :  { %2937 = vmatpush3.bf16.msra.mxu1 %v3575_v50  ;;  %v202_v50 = vshra.s32 %v3633_v15, 8  ;;  %v3818_v15 = vld [vmem:[%s4630_s0 + $0x160] sm:$0xff] }
  0xaf   :  { %v407_v19 = vpop.permute.xlu1 %406  ;;  %v404_v20 = vpop.permute.xlu0 %403  ;;  %2938 = vmatprep.subr.bf16.mxu1 %v3191_v28  ;;  %v147_v48 = vand.u32 255, %v3818_v15 }
  0xb0   :  { %vm540_vm9 = vcmp.eq.s32.totalorder %v407_v19, %v3646_v24  ;;  %vm541_vm10 = vcmp.eq.s32.totalorder %v407_v19, %v3661_v31  ;;  %vm538_vm11 = vcmp.eq.s32.totalorder %v404_v20, %v3646_v24  ;;  %vm539_vm12 = vcmp.eq.s32.totalorder %v404_v20, %v3661_v31  ;;  %974 = vperm.xlu1 %3173, %v200_v32  }
  0xb1   :  { %971 = vperm.xlu0 %3172, %v199_v33   ;;  %vm2778_vm13 = vmpackc.low %vm541_vm10, %vm539_vm12  ;;  %vm457_vm10 = vcmp.eq.s32.totalorder %v3728_v10, %v3661_v31  ;;  %v152_v10 = vand.u32 255, %v3950_v59  ;;  %v216_v33 = vshra.s32 %v3950_v59, 8  ;;  %v215_v19 = vshra.s32 %v3955_v42, 8 }
  0xb2   :  { %2779 = vmatprep.mubr.msk.bf16.mxu1 %vm2778_vm13, %v3237_v40  ;;  %vm2780_vm0 = vmpackc.low %vm540_vm9, %vm538_vm11  ;;  %2939 = vmatpush3.bf16.msra.mxu1 %v3191_v28  ;;  %vm455_vm11 = vcmp.eq.s32.totalorder %v3730_v13, %v3661_v31 }
  0xb3   :  { %v3820_v16 = vpop.permute.xlu1 %298  ;;  %2781 = vmatmul.mubr.msk.bf16.gmra.mrb[4].mxu1 %vm2780_vm0, %v3237_v40  ;;  %v3829_v38 = vpop.permute.xlu0 %295  ;;  %2940 = vmatprep.subr.bf16.mxu1 %v3192_v21  ;;  %vm2692_vm13 = vmpackc.low %vm452_vm3, %vm450_vm4  ;;  %vm454_vm0 = vcmp.eq.s32.totalorder %v3730_v13, %v3646_v24  ;;  %v151_v13 = vand.u32 255, %v3955_v42 }
  0xb4   :  { %2689 = vmatmul.mubr.msk.bf16.gmra.mrb[20].mxu0 %vm2688_vm1, %v3237_v40  ;;  %980 = vperm.xlu1 %3173, %v202_v50   ;;  %vm2694_vm14 = vmpackc.low %vm457_vm10, %vm455_vm11  ;;  %vm460_vm11 = vcmp.eq.s32.totalorder %v3740_v63, %v3646_v24  ;;  %v218_v50 = vshra.s32 %v90_v60, 8 }
  0xb5   :  { %977 = vperm.xlu0 %3172, %v201_v4   ;;  %2691 = vmatprep.mubr.msk.bf16.mxu0 %vm2690_vm2, %v3237_v40  ;;  %v217_v4 = vshra.s32 %v89_v61, 8 }
  0xb6   :  { %2941 = vmatpush3.bf16.msra.mxu1 %v3192_v21 }
  0xb7   :  { %v413_v34 = vpop.permute.xlu1 %412  ;;  %v410_v35 = vpop.permute.xlu0 %409  ;;  %2942 = vmatprep.subr.bf16.mxu1 %v3193_v30 }
  0xb8   :  { %vm544_vm5 = vcmp.eq.s32.totalorder %v413_v34, %v3646_v24  ;;  %vm545_vm6 = vcmp.eq.s32.totalorder %v413_v34, %v3661_v31  ;;  %vm542_vm7 = vcmp.eq.s32.totalorder %v410_v35, %v3646_v24  ;;  %vm543_vm8 = vcmp.eq.s32.totalorder %v410_v35, %v3661_v31  ;;  %370 = vperm.xlu1 %3173, %v148_v47  }
  0xb9   :  { %367 = vperm.xlu0 %3172, %v147_v48   ;;  %vm2782_vm9 = vmpackc.low %vm545_vm6, %vm543_vm8  ;;  %vm461_vm6 = vcmp.eq.s32.totalorder %v3740_v63, %v3661_v31  ;;  %v212_v63 = vshra.s32 %v3813_v5, 8  ;;  %v92_v5 = vld [vmem:[%s4630_s0 + $0x1a8] sm:$0xff] }
  0xba   :  { %2783 = vmatprep.mubr.msk.bf16.mxu1 %vm2782_vm9, %v3237_v40  ;;  %vm2784_vm12 = vmpackc.low %vm544_vm5, %vm542_vm7  ;;  %2943 = vmatpush3.bf16.msra.mxu1 %v3193_v30  ;;  %vm459_vm7 = vcmp.eq.s32.totalorder %v3742_v17, %v3661_v31  ;;  %v156_v30 = vand.u32 255, %v92_v5  ;;  %v220_v35 = vshra.s32 %v92_v5, 8 }
  0xbb   :  { %v3862_v44 = vpop.permute.xlu1 %304  ;;  %2785 = vmatmul.mubr.msk.bf16.gmra.mrb[8].mxu1 %vm2784_vm12, %v3237_v40  ;;  %v3871_v25 = vpop.permute.xlu0 %301  ;;  %2944 = vmatprep.subr.bf16.mxu1 %v3194_v36  ;;  %vm2696_vm9 = vmpackc.low %vm456_vm15, %vm454_vm0  ;;  %vm458_vm12 = vcmp.eq.s32.totalorder %v3742_v17, %v3646_v24  ;;  %v211_v17 = vshra.s32 %v3818_v15, 8  ;;  %v91_v15 = vld [vmem:[%s4630_s0 + $0x1a0] sm:$0xff] }
  0xbc   :  { %2693 = vmatmul.mubr.msk.bf16.gmra.mrb[24].mxu0 %vm2692_vm13, %v3237_v40  ;;  %986 = vperm.xlu1 %3173, %v204_v39   ;;  %vm2698_vm10 = vmpackc.low %vm461_vm6, %vm459_vm7  ;;  %vm464_vm7 = vcmp.eq.s32.totalorder %v3773_v12, %v3646_v24  ;;  %v155_v47 = vand.u32 255, %v91_v15 }
  0xbd   :  { %983 = vperm.xlu0 %3172, %v203_v41   ;;  %2695 = vmatprep.mubr.msk.bf16.mxu0 %vm2694_vm14, %v3237_v40 }
  0xbe   :  { %2945 = vmatpush3.bf16.msra.mxu1 %v3194_v36  ;;  %v219_v36 = vshra.s32 %v91_v15, 8 }
  0xbf   :  { %v419_v58 = vpop.permute.xlu1 %418  ;;  %v416_v46 = vpop.permute.xlu0 %415  ;;  %2946 = vmatprep.subr.bf16.mxu1 %v3195_v37 }
  0xc0   :  { %vm548_vm1 = vcmp.eq.s32.totalorder %v419_v58, %v3646_v24  ;;  %vm549_vm2 = vcmp.eq.s32.totalorder %v419_v58, %v3661_v31  ;;  %vm546_vm3 = vcmp.eq.s32.totalorder %v416_v46, %v3646_v24  ;;  %vm547_vm4 = vcmp.eq.s32.totalorder %v416_v46, %v3661_v31  ;;  %992 = vperm.xlu1 %3173, %v206_v45   ;;  %v3205_v46 = vld [vmem:[%s4630_s0 + $0x1c0] sm:$0xff] }
  0xc1   :  { %989 = vperm.xlu0 %3172, %v205_v57   ;;  %vm2786_vm5 = vmpackc.low %vm549_vm2, %vm547_vm4  ;;  %vm465_vm2 = vcmp.eq.s32.totalorder %v3773_v12, %v3661_v31  ;;  %v154_v12 = vand.u32 255, %v90_v60  ;;  %v224_v58 = vshra.s32 %v3204_v51, 8 }
  0xc2   :  { %2787 = vmatprep.mubr.msk.bf16.mxu1 %vm2786_vm5, %v3237_v40  ;;  %vm2788_vm8 = vmpackc.low %vm548_vm1, %vm546_vm3  ;;  %2947 = vmatpush3.bf16.msra.mxu1 %v3195_v37  ;;  %vm463_vm3 = vcmp.eq.s32.totalorder %v3782_v27, %v3661_v31  ;;  %v3203_v37 = vld [vmem:[%s4630_s0 + $0x1b0] sm:$0xff] }
  0xc3   :  { %v3908_v53 = vpop.permute.xlu1 %310  ;;  %2789 = vmatmul.mubr.msk.bf16.gmra.mrb[12].mxu1 %vm2788_vm8, %v3237_v40  ;;  %v3917_v3 = vpop.permute.xlu0 %307  ;;  %2948 = vmatprep.subr.bf16.mxu1 %v3196_v8  ;;  %vm2700_vm5 = vmpackc.low %vm460_vm11, %vm458_vm12  ;;  %vm462_vm8 = vcmp.eq.s32.totalorder %v3782_v27, %v3646_v24  ;;  %vm469_vm11 = vcmp.eq.s32.totalorder %v3820_v16, %v3661_v31  ;;  %vm467_vm12 = vcmp.eq.s32.totalorder %v3829_v38, %v3661_v31  ;;  %v153_v27 = vand.u32 255, %v89_v61 }
  0xc4   :  { %2697 = vmatmul.mubr.msk.bf16.gmra.mrb[28].mxu0 %vm2696_vm9, %v3237_v40  ;;  %376 = vperm.xlu1 %3173, %v150_v11   ;;  %vm2702_vm6 = vmpackc.low %vm465_vm2, %vm463_vm3  ;;  %vm468_vm3 = vcmp.eq.s32.totalorder %v3820_v16, %v3646_v24  ;;  %v221_v45 = vshra.s32 %v3203_v37, 8 }
  0xc5   :  { %373 = vperm.xlu0 %3172, %v149_v52   ;;  %2699 = vmatprep.mubr.msk.bf16.mxu0 %vm2698_vm10, %v3237_v40 }
  0xc6   :  { %2949 = vmatpush3.bf16.msra.mxu1 %v3196_v8  ;;  %v223_v8 = vshra.s32 %v3205_v46, 8 }
  0xc7   :  { %v425_v55 = vpop.permute.xlu1 %424  ;;  %v422_v56 = vpop.permute.xlu0 %421  ;;  %2950 = vmatprep.subr.bf16.mxu1 %v3197_v6 }
  0xc8   :  { %vm552_vm13 = vcmp.eq.s32.totalorder %v425_v55, %v3646_v24  ;;  %vm553_vm14 = vcmp.eq.s32.totalorder %v425_v55, %v3661_v31  ;;  %vm550_vm15 = vcmp.eq.s32.totalorder %v422_v56, %v3646_v24  ;;  %vm551_vm0 = vcmp.eq.s32.totalorder %v422_v56, %v3661_v31  ;;  %998 = vperm.xlu1 %3173, %v208_v0   ;;  %v3208_v56 = vld [vmem:[%s4630_s0 + $0x1e8] sm:$0xff] }
  0xc9   :  { %vm2790_vm1 = vmpackc.low %vm553_vm14, %vm551_vm0  ;;  %995 = vperm.xlu0 %3172, %v207_v2  }
  0xca   :  { %vm2792_vm4 = vmpackc.low %vm552_vm13, %vm550_vm15  ;;  %2791 = vmatprep.mubr.msk.bf16.mxu1 %vm2790_vm1, %v3237_v40  ;;  %2951 = vmatpush3.bf16.msra.mxu1 %v3197_v6  ;;  %v3207_v6 = vld [vmem:[%s4630_s0 + $0x1d0] sm:$0xff] }
  0xcb   :  { %v3957_v43 = vpop.permute.xlu1 %316  ;;  %2793 = vmatmul.mubr.msk.bf16.gmra.mrb[16].mxu1 %vm2792_vm4, %v3237_v40  ;;  %v3966_v9 = vpop.permute.xlu0 %313  ;;  %vm2704_vm14 = vmpackc.low %vm464_vm7, %vm462_vm8  ;;  %vm466_vm4 = vcmp.eq.s32.totalorder %v3829_v38, %v3646_v24  ;;  %v225_v0 = vshra.s32 %v3207_v6, 8 }
  0xcc   :  { %2701 = vmatmul.mubr.msk.bf16.gmra.mrb[32].mxu0 %vm2700_vm5, %v3237_v40  ;;  %1004 = vperm.xlu1 %3173, %v210_v26   ;;  %vm2706_vm1 = vmpackc.low %vm469_vm11, %vm467_vm12  ;;  %vm473_vm5 = vcmp.eq.s32.totalorder %v3862_v44, %v3661_v31  ;;  %vm472_vm12 = vcmp.eq.s32.totalorder %v3862_v44, %v3646_v24  ;;  %v3202_v44 = vld [vmem:[%s4630_s0 + $0x1b8] sm:$0xff]  ;;  %v228_v26 = vshra.s32 %v3208_v56, 8 }
  0xcd   :  { %1001 = vperm.xlu0 %3172, %v209_v29   ;;  %2703 = vmatprep.mubr.msk.bf16.mxu0 %vm2702_vm6, %v3237_v40  ;;  %vm471_vm6 = vcmp.eq.s32.totalorder %v3871_v25, %v3661_v31  ;;  %vm2708_vm7 = vmpackc.low %vm468_vm3, %vm466_vm4  ;;  %v3209_v29 = vld [vmem:[%s4630_s0 + $0x1e0] sm:$0xff] }
  0xce   :  { %v227_v59 = vshra.s32 %v3209_v29, 8 }
  0xcf   :  { %v879_v14 = vpop.permute.xlu1 %878  ;;  %v876_v62 = vpop.permute.xlu0 %875 }
  0xd0   :  { %vm1067_vm9 = vcmp.eq.s32.totalorder %v879_v14, %v3646_v24  ;;  %vm1066_vm10 = vcmp.eq.s32.totalorder %v876_v62, %v3646_v24  ;;  %382 = vperm.xlu1 %3173, %v152_v10  }
  0xd1   :  { %vm2794_vm13 = vmpackc.low %vm1067_vm9, %vm1066_vm10  ;;  %379 = vperm.xlu0 %3172, %v151_v13   ;;  %v3211_v13 = vld [vmem:[%s4630_s0 + $0x1f0] sm:$0xff] }
  0xd2   :  { %2952 = vmatprep.mubr.msk.bf16.mxu1 %vm2794_vm13, %v3237_v40  ;;  %vm2710_vm10 = vmpackc.low %vm473_vm5, %vm471_vm6  ;;  %vm470_vm13 = vcmp.eq.s32.totalorder %v3871_v25, %v3646_v24  ;;  %vm476_vm5 = vcmp.eq.s32.totalorder %v3908_v53, %v3646_v24  ;;  %vm474_vm6 = vcmp.eq.s32.totalorder %v3917_v3, %v3646_v24  ;;  %v222_v25 = vshra.s32 %v3202_v44, 8 }
  0xd3   :  { %v885_v54 = vpop.permute.xlu1 %884  ;;  %v882_v1 = vpop.permute.xlu0 %881  ;;  %vm2712_vm3 = vmpackc.low %vm472_vm12, %vm470_vm13  ;;  %v229_v14 = vshra.s32 %v3211_v13, 8 }
  0xd4   :  { %vm1069_vm15 = vcmp.eq.s32.totalorder %v885_v54, %v3646_v24  ;;  %2705 = vmatmul.mubr.msk.bf16.gmra.mrb[36].mxu0 %vm2704_vm14, %v3237_v40  ;;  %vm1068_vm0 = vcmp.eq.s32.totalorder %v882_v1, %v3646_v24  ;;  %1010 = vperm.xlu1 %3173, %v212_v63   ;;  %vm2716_vm12 = vmpackc.low %vm476_vm5, %vm474_vm6 }
  0xd5   :  { %vm2796_vm2 = vmpackc.low %vm1069_vm15, %vm1068_vm0  ;;  %1007 = vperm.xlu0 %3172, %v211_v17   ;;  %2707 = vmatprep.mubr.msk.bf16.mxu0 %vm2706_vm1, %v3237_v40  ;;  %vm477_vm1 = vcmp.eq.s32.totalorder %v3908_v53, %v3661_v31  ;;  %v3206_v53 = vld [vmem:[%s4630_s0 + $0x1d8] sm:$0xff] }
  0xd6   :  { %2953 = vmatmul.mubr.msk.bf16.vlgmr.msra.gmra.mrb[20].mxu1 %vm2796_vm2, %v3237_v40  ;;  %vm475_vm2 = vcmp.eq.s32.totalorder %v3917_v3, %v3661_v31  ;;  %v226_v3 = vshra.s32 %v3206_v53, 8 }
  0xd7   :  { %v3998_v23 = vpop.permute.xlu1 %322  ;;  %v4000_v7 = vpop.permute.xlu0 %319  ;;  %vm2714_vm4 = vmpackc.low %vm477_vm1, %vm475_vm2  ;;  %vm480_vm1 = vcmp.eq.s32.totalorder %v3957_v43, %v3646_v24  ;;  %vm478_vm2 = vcmp.eq.s32.totalorder %v3966_v9, %v3646_v24 }
  0xd8   :  { %1016 = vperm.xlu1 %3173, %v214_v18   ;;  %vm2720_vm5 = vmpackc.low %vm480_vm1, %vm478_vm2 }
  0xd9   :  { %1013 = vperm.xlu0 %3172, %v213_v22  }
  0xdb   :  { %v891_v28 = vpop.permute.xlu1 %890  ;;  %v888_v32 = vpop.permute.xlu0 %887 }
  0xdc   :  { %vm1071_vm8 = vcmp.eq.s32.totalorder %v891_v28, %v3646_v24  ;;  %2709 = vmatmul.mubr.msk.bf16.gmra.mrb[40].mxu0 %vm2708_vm7, %v3237_v40  ;;  %vm1070_vm9 = vcmp.eq.s32.totalorder %v888_v32, %v3646_v24  ;;  %388 = vperm.xlu1 %3173, %v154_v12  }
  0xdd   :  { %vm2798_vm11 = vmpackc.low %vm1071_vm8, %vm1070_vm9  ;;  %385 = vperm.xlu0 %3172, %v153_v27   ;;  %2711 = vmatprep.mubr.msk.bf16.mxu0 %vm2710_vm10, %v3237_v40  ;;  %vm481_vm9 = vcmp.eq.s32.totalorder %v3957_v43, %v3661_v31  ;;  %vm479_vm10 = vcmp.eq.s32.totalorder %v3966_v9, %v3661_v31  ;;  %v3210_v9 = vld [vmem:[%s4630_s0 + $0x1f8] sm:$0xff] }
  0xde   :  { %2956 = vmatprep.mubr.msk.bf16.mxu1 %vm2798_vm11, %v3237_v40  ;;  %vm2718_vm13 = vmpackc.low %vm481_vm9, %vm479_vm10  ;;  %vm484_vm10 = vcmp.eq.s32.totalorder %v3998_v23, %v3646_v24  ;;  %v230_v10 = vshra.s32 %v3210_v9, 8 }
  0xdf   :  { %v897_v20 = vpop.permute.xlu1 %896  ;;  %v894_v21 = vpop.permute.xlu0 %893 }
  0xe0   :  { %vm1073_vm14 = vcmp.eq.s32.totalorder %v897_v20, %v3646_v24  ;;  %vm1072_vm15 = vcmp.eq.s32.totalorder %v894_v21, %v3646_v24  ;;  %1022 = vperm.xlu1 %3173, %v216_v33  }
  0xe1   :  { %vm2800_vm0 = vmpackc.low %vm1073_vm14, %vm1072_vm15  ;;  %1019 = vperm.xlu0 %3172, %v215_v19  }
  0xe2   :  { %2957 = vmatmul.mubr.msk.bf16.gmra.mrb[24].mxu1 %vm2800_vm0, %v3237_v40 }
  0xe3   :  { %v4034_v16 = vpop.permute.xlu1 %328  ;;  %v4039_v38 = vpop.permute.xlu0 %325 }
  0xe4   :  { %2713 = vmatmul.mubr.msk.bf16.gmra.mrb[44].mxu0 %vm2712_vm3, %v3237_v40  ;;  %1028 = vperm.xlu1 %3173, %v218_v50   ;;  %vm485_vm3 = vcmp.eq.s32.totalorder %v3998_v23, %v3661_v31 }
  0xe5   :  { %1025 = vperm.xlu0 %3172, %v217_v4   ;;  %2715 = vmatprep.mubr.msk.bf16.mxu0 %vm2714_vm4, %v3237_v40  ;;  %vm483_vm4 = vcmp.eq.s32.totalorder %v4000_v7, %v3661_v31 }
  0xe6   :  { %vm2722_vm6 = vmpackc.low %vm485_vm3, %vm483_vm4  ;;  %vm488_vm3 = vcmp.eq.s32.totalorder %v4034_v16, %v3646_v24  ;;  %vm486_vm4 = vcmp.eq.s32.totalorder %v4039_v38, %v3646_v24 }
  0xe7   :  { %v903_v48 = vpop.permute.xlu1 %902  ;;  %v900_v34 = vpop.permute.xlu0 %899 }
  0xe8   :  { %vm1075_vm7 = vcmp.eq.s32.totalorder %v903_v48, %v3646_v24  ;;  %vm1074_vm8 = vcmp.eq.s32.totalorder %v900_v34, %v3646_v24  ;;  %394 = vperm.xlu1 %3173, %v156_v30  }
  0xe9   :  { %vm2802_vm11 = vmpackc.low %vm1075_vm7, %vm1074_vm8  ;;  %391 = vperm.xlu0 %3172, %v155_v47  }
  0xea   :  { %2960 = vmatprep.mubr.msk.bf16.mxu1 %vm2802_vm11, %v3237_v40  ;;  %vm482_vm11 = vcmp.eq.s32.totalorder %v4000_v7, %v3646_v24 }
  0xeb   :  { %v909_v39 = vpop.permute.xlu1 %908  ;;  %v906_v41 = vpop.permute.xlu0 %905  ;;  %vm2724_vm1 = vmpackc.low %vm484_vm10, %vm482_vm11 }
  0xec   :  { %vm1077_vm14 = vcmp.eq.s32.totalorder %v909_v39, %v3646_v24  ;;  %2717 = vmatmul.mubr.msk.bf16.gmra.mrb[48].mxu0 %vm2716_vm12, %v3237_v40  ;;  %vm1076_vm15 = vcmp.eq.s32.totalorder %v906_v41, %v3646_v24  ;;  %1034 = vperm.xlu1 %3173, %v220_v35   ;;  %vm2728_vm10 = vmpackc.low %vm488_vm3, %vm486_vm4 }
  0xed   :  { %vm2804_vm0 = vmpackc.low %vm1077_vm14, %vm1076_vm15  ;;  %1031 = vperm.xlu0 %3172, %v219_v36   ;;  %2719 = vmatprep.mubr.msk.bf16.mxu0 %vm2718_vm13, %v3237_v40  ;;  %vm489_vm15 = vcmp.eq.s32.totalorder %v4034_v16, %v3661_v31 }
  0xee   :  { %2961 = vmatmul.mubr.msk.bf16.gmra.mrb[28].mxu1 %vm2804_vm0, %v3237_v40  ;;  %vm487_vm0 = vcmp.eq.s32.totalorder %v4039_v38, %v3661_v31 }
  0xef   :  { %v4065_v57 = vpop.permute.xlu1 %334  ;;  %v4067_v49 = vpop.permute.xlu0 %331  ;;  %vm2726_vm2 = vmpackc.low %vm489_vm15, %vm487_vm0 }
  0xf0   :  { %1040 = vperm.xlu1 %3173, %v222_v25   ;;  %vm492_vm15 = vcmp.eq.s32.totalorder %v4065_v57, %v3646_v24  ;;  %vm490_vm0 = vcmp.eq.s32.totalorder %v4067_v49, %v3646_v24 }
  0xf1   :  { %1037 = vperm.xlu0 %3172, %v221_v45   ;;  %vm2732_vm3 = vmpackc.low %vm492_vm15, %vm490_vm0 }
  0xf3   :  { %v915_v11 = vpop.permute.xlu1 %914  ;;  %v912_v52 = vpop.permute.xlu0 %911 }
  0xf4   :  { %vm1079_vm7 = vcmp.eq.s32.totalorder %v915_v11, %v3646_v24  ;;  %2721 = vmatmul.mubr.msk.bf16.gmra.mrb[52].mxu0 %vm2720_vm5, %v3237_v40  ;;  %vm1078_vm8 = vcmp.eq.s32.totalorder %v912_v52, %v3646_v24  ;;  %1046 = vperm.xlu1 %3173, %v224_v58  }
  0xf5   :  { %vm2806_vm9 = vmpackc.low %vm1079_vm7, %vm1078_vm8  ;;  %1043 = vperm.xlu0 %3172, %v223_v8   ;;  %2723 = vmatprep.mubr.msk.bf16.mxu0 %vm2722_vm6, %v3237_v40  ;;  %vm493_vm7 = vcmp.eq.s32.totalorder %v4065_v57, %v3661_v31  ;;  %vm491_vm8 = vcmp.eq.s32.totalorder %v4067_v49, %v3661_v31 }
  0xf6   :  { %2964 = vmatprep.mubr.msk.bf16.mxu1 %vm2806_vm9, %v3237_v40  ;;  %vm2730_vm11 = vmpackc.low %vm493_vm7, %vm491_vm8 }
  0xf7   :  { %v921_v2 = vpop.permute.xlu1 %920  ;;  %v918_v55 = vpop.permute.xlu0 %917 }
  0xf8   :  { %vm1081_vm12 = vcmp.eq.s32.totalorder %v921_v2, %v3646_v24  ;;  %vm1080_vm13 = vcmp.eq.s32.totalorder %v918_v55, %v3646_v24  ;;  %1052 = vperm.xlu1 %3173, %v226_v3  }
  0xf9   :  { %vm2808_vm14 = vmpackc.low %vm1081_vm12, %vm1080_vm13  ;;  %1049 = vperm.xlu0 %3172, %v225_v0  }
  0xfa   :  { %2965 = vmatmul.mubr.msk.bf16.gmra.mrb[32].mxu1 %vm2808_vm14, %v3237_v40 }
  0xfb   :  { %v341_v42 = vpop.permute.xlu1 %340  ;;  %v338_v43 = vpop.permute.xlu0 %337 }
  0xfc   :  { %2725 = vmatmul.mubr.msk.bf16.gmra.mrb[56].mxu0 %vm2724_vm1, %v3237_v40  ;;  %1058 = vperm.xlu1 %3173, %v228_v26   ;;  %vm497_vm1 = vcmp.eq.s32.totalorder %v341_v42, %v3661_v31  ;;  %vm496_vm8 = vcmp.eq.s32.totalorder %v341_v42, %v3646_v24 }
  0xfd   :  { %1055 = vperm.xlu0 %3172, %v227_v59   ;;  %2727 = vmatprep.mubr.msk.bf16.mxu0 %vm2726_vm2, %v3237_v40  ;;  %vm495_vm2 = vcmp.eq.s32.totalorder %v338_v43, %v3661_v31 }
  0xfe   :  { %vm2734_vm4 = vmpackc.low %vm497_vm1, %vm495_vm2 }
  0xff   :  { %v927_v62 = vpop.permute.xlu1 %926  ;;  %v924_v63 = vpop.permute.xlu0 %923 }
 0x100   :  { %vm1083_vm5 = vcmp.eq.s32.totalorder %v927_v62, %v3646_v24  ;;  %vm1082_vm6 = vcmp.eq.s32.totalorder %v924_v63, %v3646_v24  ;;  %1064 = vperm.xlu1 %3173, %v230_v10  }
 0x101   :  { %vm2810_vm9 = vmpackc.low %vm1083_vm5, %vm1082_vm6  ;;  %1061 = vperm.xlu0 %3172, %v229_v14  }
 0x102   :  { %2968 = vmatprep.mubr.msk.bf16.mxu1 %vm2810_vm9, %v3237_v40  ;;  %vm494_vm9 = vcmp.eq.s32.totalorder %v338_v43, %v3646_v24 }
 0x103   :  { %v933_v17 = vpop.permute.xlu1 %932  ;;  %v930_v54 = vpop.permute.xlu0 %929  ;;  %vm2736_vm15 = vmpackc.low %vm496_vm8, %vm494_vm9 }
 0x104   :  { %vm1085_vm12 = vcmp.eq.s32.totalorder %v933_v17, %v3646_v24  ;;  %2729 = vmatmul.mubr.msk.bf16.gmra.mrb[60].mxu0 %vm2728_vm10, %v3237_v40  ;;  %vm1084_vm13 = vcmp.eq.s32.totalorder %v930_v54, %v3646_v24 }
 0x105   :  { %vm2812_vm14 = vmpackc.low %vm1085_vm12, %vm1084_vm13  ;;  %2731 = vmatprep.mubr.msk.bf16.mxu0 %vm2730_vm11, %v3237_v40 }
 0x106   :  { %2969 = vmatmul.mubr.msk.bf16.gmra.mrb[36].mxu1 %vm2812_vm14, %v3237_v40 }
 0x107   :  { %v347_v1 = vpop.permute.xlu1 %346  ;;  %v344_v18 = vpop.permute.xlu0 %343 }
 0x108   :  { %vm501_vm10 = vcmp.eq.s32.totalorder %v347_v1, %v3661_v31  ;;  %vm499_vm11 = vcmp.eq.s32.totalorder %v344_v18, %v3661_v31  ;;  %vm500_vm1 = vcmp.eq.s32.totalorder %v347_v1, %v3646_v24  ;;  %vm498_vm2 = vcmp.eq.s32.totalorder %v344_v18, %v3646_v24 }
 0x109   :  { %vm2738_vm0 = vmpackc.low %vm501_vm10, %vm499_vm11 }
 0x10a   :  { %vm2740_vm8 = vmpackc.low %vm500_vm1, %vm498_vm2 }
 0x10b   :  { %v939_v22 = vpop.permute.xlu1 %938 }
 0x10c   :  { %2733 = vmatmul.mubr.msk.bf16.gmra.mrb[64].mxu0 %vm2732_vm3, %v3237_v40  ;;  %v936_v60 = vpop.permute.xlu0 %935  ;;  %vm1087_vm5 = vcmp.eq.s32.totalorder %v939_v22, %v3646_v24 }
 0x10d   :  { %vm1086_vm6 = vcmp.eq.s32.totalorder %v936_v60, %v3646_v24  ;;  %2735 = vmatprep.mubr.msk.bf16.mxu0 %vm2734_vm4, %v3237_v40 }
 0x10e   :  { %vm2814_vm7 = vmpackc.low %vm1087_vm5, %vm1086_vm6 }
 0x10f   :  { %2972 = vmatprep.mubr.msk.bf16.mxu1 %vm2814_vm7, %v3237_v40  ;;  %v945_v61 = vpop.permute.xlu1 %944 }
 0x110   :  { %v942_v23 = vpop.permute.xlu0 %941  ;;  %vm1089_vm12 = vcmp.eq.s32.totalorder %v945_v61, %v3646_v24 }
 0x111   :  { %vm1088_vm13 = vcmp.eq.s32.totalorder %v942_v23, %v3646_v24 }
 0x112   :  { %vm2816_vm14 = vmpackc.low %vm1089_vm12, %vm1088_vm13 }
 0x113   :  { %2973 = vmatmul.mubr.msk.bf16.gmra.mrb[40].mxu1 %vm2816_vm14, %v3237_v40  ;;  %v353_v7 = vpop.permute.xlu1 %352 }
 0x114   :  { %2737 = vmatmul.mubr.msk.bf16.gmra.mrb[68].mxu0 %vm2736_vm15, %v3237_v40  ;;  %v350_v12 = vpop.permute.xlu0 %349  ;;  %vm505_vm3 = vcmp.eq.s32.totalorder %v353_v7, %v3661_v31  ;;  %vm504_vm13 = vcmp.eq.s32.totalorder %v353_v7, %v3646_v24 }
 0x115   :  { %2739 = vmatprep.mubr.msk.bf16.mxu0 %vm2738_vm0, %v3237_v40  ;;  %vm503_vm4 = vcmp.eq.s32.totalorder %v350_v12, %v3661_v31  ;;  %vm502_vm14 = vcmp.eq.s32.totalorder %v350_v12, %v3646_v24 }
 0x116   :  { %vm2742_vm9 = vmpackc.low %vm505_vm3, %vm503_vm4 }
 0x117   :  { %v951_v27 = vpop.permute.xlu1 %950  ;;  %vm2744_vm1 = vmpackc.low %vm504_vm13, %vm502_vm14 }
 0x118   :  { %v948_v28 = vpop.permute.xlu0 %947  ;;  %vm1091_vm5 = vcmp.eq.s32.totalorder %v951_v27, %v3646_v24 }
 0x119   :  { %vm1090_vm6 = vcmp.eq.s32.totalorder %v948_v28, %v3646_v24 }
 0x11a   :  { %vm2818_vm7 = vmpackc.low %vm1091_vm5, %vm1090_vm6 }
 0x11b   :  { %2976 = vmatprep.mubr.msk.bf16.mxu1 %vm2818_vm7, %v3237_v40  ;;  %v957_v32 = vpop.permute.xlu1 %956 }
 0x11c   :  { %2741 = vmatmul.mubr.msk.bf16.gmra.mrb[72].mxu0 %vm2740_vm8, %v3237_v40  ;;  %v954_v33 = vpop.permute.xlu0 %953  ;;  %vm1093_vm10 = vcmp.eq.s32.totalorder %v957_v32, %v3646_v24 }
 0x11d   :  { %vm1092_vm11 = vcmp.eq.s32.totalorder %v954_v33, %v3646_v24  ;;  %2743 = vmatprep.mubr.msk.bf16.mxu0 %vm2742_vm9, %v3237_v40 }
 0x11e   :  { %vm2820_vm12 = vmpackc.low %vm1093_vm10, %vm1092_vm11 }
 0x11f   :  { %2977 = vmatmul.mubr.msk.bf16.gmra.mrb[44].mxu1 %vm2820_vm12, %v3237_v40  ;;  %v359_v19 = vpop.permute.xlu1 %358 }
 0x120   :  { %v356_v20 = vpop.permute.xlu0 %355  ;;  %vm509_vm15 = vcmp.eq.s32.totalorder %v359_v19, %v3661_v31  ;;  %vm508_vm6 = vcmp.eq.s32.totalorder %v359_v19, %v3646_v24 }
 0x121   :  { %vm507_vm0 = vcmp.eq.s32.totalorder %v356_v20, %v3661_v31  ;;  %vm506_vm7 = vcmp.eq.s32.totalorder %v356_v20, %v3646_v24  ;;  %v2217_v20 = vld [vmem:[%s4634_s4] sm:$0xff] }
 0x122   :  { %vm2746_vm2 = vmpackc.low %vm509_vm15, %vm507_vm0 }
 0x123   :  { %v963_v21 = vpop.permute.xlu1 %962  ;;  %vm2748_vm11 = vmpackc.low %vm508_vm6, %vm506_vm7 }
 0x124   :  { %2745 = vmatmul.mubr.msk.bf16.gmra.mrb[76].mxu0 %vm2744_vm1, %v3237_v40  ;;  %v960_v50 = vpop.permute.xlu0 %959  ;;  %vm1095_vm3 = vcmp.eq.s32.totalorder %v963_v21, %v3646_v24  ;;  %v2218_v21 = vld [vmem:[%s4634_s4 + $0x8] sm:$0xff] }
 0x125   :  { %vm1094_vm4 = vcmp.eq.s32.totalorder %v960_v50, %v3646_v24  ;;  %2747 = vmatprep.mubr.msk.bf16.mxu0 %vm2746_vm2, %v3237_v40 }
 0x126   :  { %vm2822_vm5 = vmpackc.low %vm1095_vm3, %vm1094_vm4 }
 0x127   :  { %2980 = vmatprep.mubr.msk.bf16.mxu1 %vm2822_vm5, %v3237_v40  ;;  %v969_v4 = vpop.permute.xlu1 %968 }
 0x128   :  { %v966_v5 = vpop.permute.xlu0 %965  ;;  %vm1097_vm8 = vcmp.eq.s32.totalorder %v969_v4, %v3646_v24  ;;  %v3238_v4 = vmov 0.0|0.0  }
 0x129   :  { %vm1096_vm9 = vcmp.eq.s32.totalorder %v966_v5, %v3646_v24  ;;  %3086 = vmatprep.subr.bf16.mxu1 %v3238_v4  ;;  %v3087_v5 = vpack.c.bf16 %v2218_v21, %v2217_v20 }
 0x12a   :  { %vm2824_vm10 = vmpackc.low %vm1097_vm8, %vm1096_vm9 }
 0x12b   :  { %2981 = vmatmul.mubr.msk.bf16.gmra.mrb[48].mxu1 %vm2824_vm10, %v3237_v40  ;;  %v365_v15 = vpop.permute.xlu1 %364 }
 0x12c   :  { %2749 = vmatmul.mubr.msk.bf16.gmra.mrb[80].mxu0 %vm2748_vm11, %v3237_v40  ;;  %v362_v16 = vpop.permute.xlu0 %361  ;;  %vm513_vm12 = vcmp.eq.s32.totalorder %v365_v15, %v3661_v31  ;;  %vm512_vm15 = vcmp.eq.s32.totalorder %v365_v15, %v3646_v24  ;;  %3088 = vmatpush3.bf16.msra.mxu1 %v3087_v5 }
 0x12d   :  { %vm511_vm13 = vcmp.eq.s32.totalorder %v362_v16, %v3661_v31  ;;  %vm510_vm0 = vcmp.eq.s32.totalorder %v362_v16, %v3646_v24  ;;  %3089 = vmatprep.subr.bf16.mxu1 %v3238_v4 }
 0x12e   :  { %vm2750_vm14 = vmpackc.low %vm513_vm12, %vm511_vm13 }
 0x12f   :  { %2751 = vmatprep.mubr.msk.bf16.mxu0 %vm2750_vm14, %v3237_v40  ;;  %v975_v38 = vpop.permute.xlu1 %974  ;;  %vm2752_vm4 = vmpackc.low %vm512_vm15, %vm510_vm0 }
 0x130   :  { %v972_v30 = vpop.permute.xlu0 %971  ;;  %vm1099_vm1 = vcmp.eq.s32.totalorder %v975_v38, %v3646_v24 }
 0x131   :  { %vm1098_vm2 = vcmp.eq.s32.totalorder %v972_v30, %v3646_v24 }
 0x132   :  { %vm2826_vm3 = vmpackc.low %vm1099_vm1, %vm1098_vm2 }
 0x133   :  { %2984 = vmatprep.mubr.msk.bf16.mxu1 %vm2826_vm3, %v3237_v40  ;;  %v981_v47 = vpop.permute.xlu1 %980 }
 0x134   :  { %2753 = vmatmul.mubr.msk.bf16.gmra.mrb[84].mxu0 %vm2752_vm4, %v3237_v40  ;;  %v978_v48 = vpop.permute.xlu0 %977  ;;  %vm1101_vm5 = vcmp.eq.s32.totalorder %v981_v47, %v3646_v24 }
 0x135   :  { %vm1100_vm6 = vcmp.eq.s32.totalorder %v978_v48, %v3646_v24 }
 0x136   :  { %vm2828_vm7 = vmpackc.low %vm1101_vm5, %vm1100_vm6 }
 0x137   :  { %2985 = vmatmul.mubr.msk.bf16.gmra.mrb[52].mxu1 %vm2828_vm7, %v3237_v40  ;;  %v371_v34 = vpop.permute.xlu1 %370 }
 0x138   :  { %v368_v35 = vpop.permute.xlu0 %367  ;;  %vm516_vm8 = vcmp.eq.s32.totalorder %v371_v34, %v3646_v24  ;;  %vm517_vm9 = vcmp.eq.s32.totalorder %v371_v34, %v3661_v31 }
 0x139   :  { %vm514_vm10 = vcmp.eq.s32.totalorder %v368_v35, %v3646_v24  ;;  %vm515_vm11 = vcmp.eq.s32.totalorder %v368_v35, %v3661_v31 }
 0x13a   :  { %vm2754_vm12 = vmpackc.low %vm517_vm9, %vm515_vm11 }
 0x13b   :  { %vm2756_vm13 = vmpackc.low %vm516_vm8, %vm514_vm10  ;;  %2755 = vmatprep.mubr.msk.bf16.mxu0 %vm2754_vm12, %v3237_v40  ;;  %v987_v36 = vpop.permute.xlu1 %986 }
 0x13c   :  { %2757 = vmatmul.mubr.msk.bf16.gmra.mrb[88].mxu0 %vm2756_vm13, %v3237_v40  ;;  %v984_v39 = vpop.permute.xlu0 %983  ;;  %vm1103_vm14 = vcmp.eq.s32.totalorder %v987_v36, %v3646_v24 }
 0x13d   :  { %vm1102_vm15 = vcmp.eq.s32.totalorder %v984_v39, %v3646_v24 }
 0x13e   :  { %vm2830_vm0 = vmpackc.low %vm1103_vm14, %vm1102_vm15 }
 0x13f   :  { %2988 = vmatprep.mubr.msk.bf16.mxu1 %vm2830_vm0, %v3237_v40  ;;  %v993_v41 = vpop.permute.xlu1 %992 }
 0x140   :  { %v990_v44 = vpop.permute.xlu0 %989  ;;  %vm1105_vm1 = vcmp.eq.s32.totalorder %v993_v41, %v3646_v24 }
 0x141   :  { %vm1104_vm2 = vcmp.eq.s32.totalorder %v990_v44, %v3646_v24 }
 0x142   :  { %vm2832_vm3 = vmpackc.low %vm1105_vm1, %vm1104_vm2 }
 0x143   :  { %2989 = vmatmul.mubr.msk.bf16.gmra.mrb[56].mxu1 %vm2832_vm3, %v3237_v40  ;;  %v377_v25 = vpop.permute.xlu1 %376 }
 0x144   :  { %v374_v37 = vpop.permute.xlu0 %373  ;;  %vm520_vm4 = vcmp.eq.s32.totalorder %v377_v25, %v3646_v24  ;;  %vm521_vm5 = vcmp.eq.s32.totalorder %v377_v25, %v3661_v31 }
 0x145   :  { %vm518_vm6 = vcmp.eq.s32.totalorder %v374_v37, %v3646_v24  ;;  %vm519_vm7 = vcmp.eq.s32.totalorder %v374_v37, %v3661_v31 }
 0x146   :  { %vm2758_vm8 = vmpackc.low %vm521_vm5, %vm519_vm7 }
 0x147   :  { %vm2760_vm9 = vmpackc.low %vm520_vm4, %vm518_vm6  ;;  %2759 = vmatprep.mubr.msk.bf16.mxu0 %vm2758_vm8, %v3237_v40  ;;  %v999_v45 = vpop.permute.xlu1 %998 }
 0x148   :  { %2761 = vmatmul.mubr.msk.bf16.gmra.mrb[92].mxu0 %vm2760_vm9, %v3237_v40  ;;  %v996_v57 = vpop.permute.xlu0 %995  ;;  %vm1107_vm10 = vcmp.eq.s32.totalorder %v999_v45, %v3646_v24 }
 0x149   :  { %vm1106_vm11 = vcmp.eq.s32.totalorder %v996_v57, %v3646_v24 }
 0x14a   :  { %vm2834_vm12 = vmpackc.low %vm1107_vm10, %vm1106_vm11 }
 0x14b   :  { %2992 = vmatprep.mubr.msk.bf16.mxu1 %vm2834_vm12, %v3237_v40  ;;  %v1005_v49 = vpop.permute.xlu1 %1004 }
 0x14c   :  { %v1002_v51 = vpop.permute.xlu0 %1001  ;;  %vm1109_vm13 = vcmp.eq.s32.totalorder %v1005_v49, %v3646_v24 }
 0x14d   :  { %vm1108_vm14 = vcmp.eq.s32.totalorder %v1002_v51, %v3646_v24 }
 0x14e   :  { %vm2836_vm15 = vmpackc.low %vm1109_vm13, %vm1108_vm14 }
 0x14f   :  { %2993 = vmatmul.mubr.msk.bf16.gmra.mrb[60].mxu1 %vm2836_vm15, %v3237_v40  ;;  %v383_v58 = vpop.permute.xlu1 %382 }
 0x150   :  { %v380_v46 = vpop.permute.xlu0 %379  ;;  %vm524_vm0 = vcmp.eq.s32.totalorder %v383_v58, %v3646_v24  ;;  %vm525_vm1 = vcmp.eq.s32.totalorder %v383_v58, %v3661_v31 }
 0x151   :  { %vm522_vm2 = vcmp.eq.s32.totalorder %v380_v46, %v3646_v24  ;;  %vm523_vm3 = vcmp.eq.s32.totalorder %v380_v46, %v3661_v31 }
 0x152   :  { %vm2762_vm4 = vmpackc.low %vm525_vm1, %vm523_vm3 }
 0x153   :  { %vm2764_vm5 = vmpackc.low %vm524_vm0, %vm522_vm2  ;;  %2763 = vmatprep.mubr.msk.bf16.mxu0 %vm2762_vm4, %v3237_v40  ;;  %v1011_v8 = vpop.permute.xlu1 %1010 }
 0x154   :  { %2765 = vmatmul.mubr.msk.bf16.gmra.mrb[96].mxu0 %vm2764_vm5, %v3237_v40  ;;  %v1008_v11 = vpop.permute.xlu0 %1007  ;;  %vm1111_vm6 = vcmp.eq.s32.totalorder %v1011_v8, %v3646_v24 }
 0x155   :  { %vm1110_vm7 = vcmp.eq.s32.totalorder %v1008_v11, %v3646_v24 }
 0x156   :  { %vm2838_vm8 = vmpackc.low %vm1111_vm6, %vm1110_vm7 }
 0x157   :  { %2996 = vmatprep.mubr.msk.bf16.mxu1 %vm2838_vm8, %v3237_v40  ;;  %v1017_v52 = vpop.permute.xlu1 %1016 }
 0x158   :  { %v1014_v53 = vpop.permute.xlu0 %1013  ;;  %vm1113_vm9 = vcmp.eq.s32.totalorder %v1017_v52, %v3646_v24 }
 0x159   :  { %vm1112_vm10 = vcmp.eq.s32.totalorder %v1014_v53, %v3646_v24 }
 0x15a   :  { %vm2840_vm11 = vmpackc.low %vm1113_vm9, %vm1112_vm10 }
 0x15b   :  { %2997 = vmatmul.mubr.msk.bf16.gmra.mrb[64].mxu1 %vm2840_vm11, %v3237_v40  ;;  %v389_v3 = vpop.permute.xlu1 %388 }
 0x15c   :  { %v386_v6 = vpop.permute.xlu0 %385  ;;  %vm528_vm12 = vcmp.eq.s32.totalorder %v389_v3, %v3646_v24  ;;  %vm529_vm13 = vcmp.eq.s32.totalorder %v389_v3, %v3661_v31 }
 0x15d   :  { %vm526_vm14 = vcmp.eq.s32.totalorder %v386_v6, %v3646_v24  ;;  %vm527_vm15 = vcmp.eq.s32.totalorder %v386_v6, %v3661_v31  ;;  %v2219_v6 = vld [vmem:[%s4634_s4 + $0x10] sm:$0xff] }
 0x15e   :  { %vm2766_vm0 = vmpackc.low %vm529_vm13, %vm527_vm15 }
 0x15f   :  { %vm2768_vm1 = vmpackc.low %vm528_vm12, %vm526_vm14  ;;  %v4234_v0 = vpop.f32.mrb[0].mxu0  ;;  %2767 = vmatprep.mubr.msk.bf16.mxu0 %vm2766_vm0, %v3237_v40  ;;  %v1023_v2 = vpop.permute.xlu1 %1022 }
 0x160   :  { %v1525_v55 = vpop.f32.mrb[1].mxu0  ;;  %2769 = vmatmul.mubr.msk.bf16.gmra.mrb[100].mxu0 %vm2768_vm1, %v3237_v40  ;;  %vm1115_vm2 = vcmp.eq.s32.totalorder %v1023_v2, %v3646_v24  ;;  %v1020_v56 = vpop.permute.xlu0 %1019  ;;  %v2220_v2 = vld [vmem:[%s4634_s4 + $0x18] sm:$0xff] }
 0x161   :  { %v4239_v26 = vpop.f32.mrb[2].mxu0  ;;  %vm1114_vm3 = vcmp.eq.s32.totalorder %v1020_v56, %v3646_v24 }
 0x162   :  { %v1528_v29 = vpop.f32.mrb[3].mxu0  ;;  %vm2842_vm4 = vmpackc.low %vm1115_vm2, %vm1114_vm3 }
 0x163   :  { %3000 = vmatprep.mubr.msk.bf16.mxu1 %vm2842_vm4, %v3237_v40  ;;  %v1029_v59 = vpop.permute.xlu1 %1028  ;;  %v3090_v29 = vpack.c.bf16 %v2220_v2, %v2219_v6 }
 0x164   :  { %vm1117_vm5 = vcmp.eq.s32.totalorder %v1029_v59, %v3646_v24  ;;  %v1026_v42 = vpop.permute.xlu0 %1025 }
 0x165   :  { %vm1116_vm6 = vcmp.eq.s32.totalorder %v1026_v42, %v3646_v24  ;;  %3091 = vmatpush3.bf16.msra.mxu1 %v3090_v29 }
 0x166   :  { %vm2844_vm7 = vmpackc.low %vm1117_vm5, %vm1116_vm6  ;;  %3092 = vmatprep.subr.bf16.mxu1 %v3238_v4 }
 0x167   :  { %v4245_v43 = vpop.f32.mrb[4].mxu0  ;;  %3001 = vmatmul.mubr.msk.bf16.gmra.mrb[68].mxu1 %vm2844_vm7, %v3237_v40  ;;  %v395_v9 = vpop.permute.xlu1 %394 }
 0x168   :  { %v1533_v10 = vpop.f32.mrb[5].mxu0  ;;  %vm532_vm8 = vcmp.eq.s32.totalorder %v395_v9, %v3646_v24  ;;  %vm533_vm9 = vcmp.eq.s32.totalorder %v395_v9, %v3661_v31  ;;  %v392_v13 = vpop.permute.xlu0 %391 }
 0x169   :  { %v4250_v14 = vpop.f32.mrb[6].mxu0  ;;  %vm530_vm10 = vcmp.eq.s32.totalorder %v392_v13, %v3646_v24  ;;  %vm531_vm11 = vcmp.eq.s32.totalorder %v392_v13, %v3661_v31 }
 0x16a   :  { %v1536_v62 = vpop.f32.mrb[7].mxu0  ;;  %vm2770_vm12 = vmpackc.low %vm533_vm9, %vm531_vm11 }
 0x16b   :  { %vm2772_vm13 = vmpackc.low %vm532_vm8, %vm530_vm10  ;;  %2771 = vmatprep.mubr.msk.bf16.mxu0 %vm2770_vm12, %v3237_v40  ;;  %v1035_v63 = vpop.permute.xlu1 %1034 }
 0x16c   :  { %vm1119_vm14 = vcmp.eq.s32.totalorder %v1035_v63, %v3646_v24  ;;  %2773 = vmatmul.mubr.msk.bf16.gmra.mrb[104].mxu0 %vm2772_vm13, %v3237_v40  ;;  %v1032_v17 = vpop.permute.xlu0 %1031 }
 0x16d   :  { %vm1118_vm15 = vcmp.eq.s32.totalorder %v1032_v17, %v3646_v24 }
 0x16e   :  { %vm2846_vm0 = vmpackc.low %vm1119_vm14, %vm1118_vm15 }
 0x16f   :  { %v4258_v54 = vpop.f32.mrb[8].mxu0  ;;  %3004 = vmatprep.mubr.msk.bf16.mxu1 %vm2846_vm0, %v3237_v40  ;;  %v1041_v1 = vpop.permute.xlu1 %1040  ;;  %vm3240_vm0 = vmmov 0  }
 0x170   :  { %v1541_v31 = vpop.f32.mrb[9].mxu0  ;;  %vm1121_vm1 = vcmp.eq.s32.totalorder %v1041_v1, %v3646_v24  ;;  %v1038_v18 = vpop.permute.xlu0 %1037 }
 0x171   :  { %v4262_v22 = vpop.f32.mrb[10].mxu0  ;;  %vm1120_vm2 = vcmp.eq.s32.totalorder %v1038_v18, %v3646_v24  ;;  %v2221_v18 = vld [vmem:[%s4634_s4 + $0x20] sm:$0xff] }
 0x172   :  { %v1544_v60 = vpop.f32.mrb[11].mxu0  ;;  %vm2848_vm3 = vmpackc.low %vm1121_vm1, %vm1120_vm2  ;;  %vm2208_vm1 = vcmask 1041409  }
 0x173   :  { %3005 = vmatmul.mubr.msk.bf16.gmra.mrb[72].mxu1 %vm2848_vm3, %v3237_v40  ;;  %v1047_v61 = vpop.permute.xlu1 %1046  ;;  %v2222_v60 = vld [vmem:[%s4634_s4 + $0x28] sm:$0xff]  ;;  %vm2403_vm3 = vcmask 1041408  }
 0x174   :  { %vm1123_vm4 = vcmp.eq.s32.totalorder %v1047_v61, %v3646_v24  ;;  %v1044_v23 = vpop.permute.xlu0 %1043 }
 0x175   :  { %vm1122_vm5 = vcmp.eq.s32.totalorder %v1044_v23, %v3646_v24 }
 0x176   :  { %vm2850_vm6 = vmpackc.low %vm1123_vm4, %vm1122_vm5 }
 0x177   :  { %v4268_v7 = vpop.f32.mrb[12].mxu0  ;;  %3008 = vmatprep.mubr.msk.bf16.mxu1 %vm2850_vm6, %v3237_v40  ;;  %v1053_v12 = vpop.permute.xlu1 %1052 }
 0x178   :  { %v1549_v27 = vpop.f32.mrb[13].mxu0  ;;  %vm1125_vm7 = vcmp.eq.s32.totalorder %v1053_v12, %v3646_v24  ;;  %v1050_v28 = vpop.permute.xlu0 %1049  ;;  %v3093_v12 = vpack.c.bf16 %v2222_v60, %v2221_v18 }
 0x179   :  { %v4272_v32 = vpop.f32.mrb[14].mxu0  ;;  %vm1124_vm8 = vcmp.eq.s32.totalorder %v1050_v28, %v3646_v24  ;;  %v4347_v28 = vld [vmem:[%s4633_s3] ss:$0 sm:$0xff] }
 0x17a   :  { %v1552_v33 = vpop.f32.mrb[15].mxu0  ;;  %vm2852_vm9 = vmpackc.low %vm1125_vm7, %vm1124_vm8  ;;  %3094 = vmatpush3.bf16.msra.mxu1 %v3093_v12  ;;  %v1524_v21 = vadd.f32 %v4347_v28, %v4234_v0  ;;  %v2223_v0 = vld [vmem:[%s4634_s4 + $0x30] sm:$0xff]  ;;  %v1551_v18 = vadd.f32 %v4347_v28, %v4272_v32  ;;  %v1543_v12 = vadd.f32 %v4347_v28, %v4262_v22 }
 0x17b   :  { %3009 = vmatmul.mubr.msk.bf16.gmra.mrb[76].mxu1 %vm2852_vm9, %v3237_v40  ;;  %v1059_v19 = vpop.permute.xlu1 %1058  ;;  %3095 = vmatprep.subr.bf16.mxu1 %v3238_v4 }
 0x17c   :  { %vm1127_vm10 = vcmp.eq.s32.totalorder %v1059_v19, %v3646_v24  ;;  %v1056_v50 = vpop.permute.xlu0 %1055  ;;  %v1532_v19 = vadd.f32 %v4347_v28, %v4245_v43 }
 0x17d   :  { %vm1126_vm11 = vcmp.eq.s32.totalorder %v1056_v50, %v3646_v24 }
 0x17e   :  { %v4285_v15 = vpop.f32.mrb[0].mxu1  ;;  %vm2854_vm12 = vmpackc.low %vm1127_vm10, %vm1126_vm11 }
 0x17f   :  { %v4287_v16 = vpop.f32.mrb[16].mxu0  ;;  %v1741_v38 = vpop.f32.mrb[1].mxu1  ;;  %3012 = vmatprep.mubr.msk.bf16.mxu1 %vm2854_vm12, %v3237_v40 }
 0x180   :  { %v1065_v30 = vpop.permute.xlu1 %1064  ;;  %v1557_v47 = vpop.f32.mrb[17].mxu0  ;;  %v1535_v38 = vadd.f32 %v4347_v28, %v4250_v14 }
 0x181   :  { %vm1129_vm13 = vcmp.eq.s32.totalorder %v1065_v30, %v3646_v24  ;;  %v1062_v48 = vpop.permute.xlu0 %1061  ;;  %v4292_v34 = vpop.f32.mrb[18].mxu0 }
 0x182   :  { %vm1128_vm14 = vcmp.eq.s32.totalorder %v1062_v48, %v3646_v24  ;;  %v4295_v35 = vpop.f32.mrb[2].mxu1  ;;  %v1560_v36 = vpop.f32.mrb[19].mxu0 }
 0x183   :  { %vm2856_vm15 = vmpackc.low %vm1129_vm13, %vm1128_vm14  ;;  %v1744_v39 = vpop.f32.mrb[3].mxu1  ;;  %v1527_v36 = vadd.f32 %v4347_v28, %v4239_v26 }
 0x184   :  { %3013 = vmatmul.mubr.msk.bf16.gmra.mrb[80].mxu1 %vm2856_vm15, %v3237_v40 }
 0x186   :  { %v4298_v41 = vpop.f32.mrb[4].mxu1 }
 0x187   :  { %v4300_v44 = vpop.f32.mrb[20].mxu0  ;;  %v1749_v25 = vpop.f32.mrb[5].mxu1 }
 0x188   :  { %v1565_v37 = vpop.f32.mrb[21].mxu0  ;;  %v4302_v45 = vpop.f32.mrb[6].mxu1  ;;  %v1564_v22 = vadd.f32 %v4347_v28, %v4300_v44 }
 0x189   :  { %v4304_v57 = vpop.f32.mrb[22].mxu0  ;;  %v1752_v49 = vpop.f32.mrb[7].mxu1 }
 0x18a   :  { %v1568_v51 = vpop.f32.mrb[23].mxu0  ;;  %v2224_v49 = vld [vmem:[%s4634_s4 + $0x38] sm:$0xff] }
 0x18b   :  { %v3096_v14 = vpack.c.bf16 %v2224_v49, %v2223_v0  ;;  %v1556_v49 = vadd.f32 %v4347_v28, %v4287_v16  ;;  %v1559_v16 = vadd.f32 %v4347_v28, %v4292_v34 }
 0x18d   :  { %3097 = vmatpush3.bf16.msra.mxu1 %v3096_v14 }
 0x18e   :  { %v4306_v24 = vpop.f32.mrb[8].mxu1  ;;  %3098 = vmatprep.subr.bf16.mxu1 %v3238_v4 }
 0x18f   :  { %v4308_v58 = vpop.f32.mrb[24].mxu0  ;;  %v1757_v46 = vpop.f32.mrb[9].mxu1 }
 0x190   :  { %v1573_v8 = vpop.f32.mrb[25].mxu0  ;;  %v4310_v11 = vpop.f32.mrb[10].mxu1 }
 0x191   :  { %v4312_v40 = vpop.f32.mrb[26].mxu0  ;;  %v1760_v52 = vpop.f32.mrb[11].mxu1 }
 0x192   :  { %v1576_v53 = vpop.f32.mrb[27].mxu0 }
 0x196   :  { %v4314_v3 = vpop.f32.mrb[12].mxu1 }
 0x197   :  { %v4322_v55 = vpop.f32.mrb[28].mxu0  ;;  %v1765_v56 = vpop.f32.mrb[13].mxu1 }
 0x198   :  { %v1581_v59 = vpop.f32.mrb[29].mxu0  ;;  %v4324_v42 = vpop.f32.mrb[14].mxu1 }
 0x199   :  { %v4326_v9 = vpop.f32.mrb[30].mxu0  ;;  %v1768_v10 = vpop.f32.mrb[15].mxu1 }
 0x19a   :  { %v1584_v13 = vpop.f32.mrb[31].mxu0  ;;  %v1548_v10 = vadd.f32 %v4347_v28, %v4268_v7 }
 0x19b   :  { %v1540_v13 = vadd.f32 %v4347_v28, %v4258_v54 }
 0x19e   :  { %v4329_v62 = vpop.f32.mrb[16].mxu1 }
 0x19f   :  { %v4331_v63 = vpop.f32.mrb[32].mxu0  ;;  %v1773_v17 = vpop.f32.mrb[17].mxu1 }
 0x1a0   :  { %v1589_v1 = vpop.f32.mrb[33].mxu0  ;;  %v4333_v31 = vpop.f32.mrb[18].mxu1 }
 0x1a1   :  { %v4341_v61 = vpop.f32.mrb[34].mxu0  ;;  %v1776_v23 = vpop.f32.mrb[19].mxu1 }
 0x1a2   :  { %v1592_v27 = vpop.f32.mrb[35].mxu0 }
 0x1a7   :  { %v4349_v33 = vpop.f32.mrb[36].mxu0 }
 0x1a8   :  { %v1597_v20 = vpop.f32.mrb[37].mxu0 }
 0x1a9   :  { %v4355_v50 = vpop.f32.mrb[38].mxu0  ;;  %v2954_v5 = vpop.f32.mrb[20].mxu1 }
 0x1aa   :  { %v1600_v30 = vpop.f32.mrb[39].mxu0  ;;  %v1821_v47 = vadd.f32 %v2954_v5, %v1532_v19  ;;  %v1812_v48 = vpop.f32.mrb[21].mxu1 }
 0x1ab   :  { %v1813_v39 = vadd.f32 %v1812_v48, %v1524_v21  ;;  %v2955_v25 = vpop.f32.mrb[22].mxu1 }
 0x1ac   :  { %v1824_v37 = vadd.f32 %v2955_v25, %v1535_v38  ;;  %v1815_v43 = vpop.f32.mrb[23].mxu1  ;;  %v2069_v53 = vmax.f32 %v1821_v47, 0.0 }
 0x1ad   :  { %v1816_v51 = vadd.f32 %v1815_v43, %v1527_v36  ;;  %v2067_v46 = vmax.f32 %v1813_v39, 0.0 }
 0x1ae   :  { %v2070_v29 = vmax.f32 %v1824_v37, 0.0 }
 0x1af   :  { %v2068_v8 = vmax.f32 %v1816_v51, 0.0  ;;  %v4367_v52 = vpop.f32.mrb[40].mxu0 }
 0x1b0   :  { %v1605_v26 = vpop.f32.mrb[41].mxu0 }
 0x1b1   :  { %v2132_v6 = vadd.f32 %v2068_v8, %v2067_v46  ;;  %v4370_v2 = vpop.f32.mrb[42].mxu0  ;;  %v2225_v8 = vld [vmem:[%s4634_s4 + $0x40] sm:$0xff]  ;;  %v2226_v26 = vld [vmem:[%s4634_s4 + $0x48] sm:$0xff] }
 0x1b2   :  { %v1608_v56 = vpop.f32.mrb[43].mxu0 }
 0x1b3   :  { %v2133_v59 = vadd.f32 %v2132_v6, %v2069_v53  ;;  %v1567_v53 = vadd.f32 %v4347_v28, %v4304_v57 }
 0x1b5   :  { %v2958_v17 = vpop.f32.mrb[24].mxu1  ;;  %v2134_v1 = vadd.f32 %v2133_v59, %v2070_v29  ;;  %v3099_v29 = vpack.c.bf16 %v2226_v26, %v2225_v8  ;;  %v2228_v26 = vld [vmem:[%s4634_s4 + $0x58] sm:$0xff] }
 0x1b6   :  { %v1837_v60 = vadd.f32 %v2958_v17, %v1548_v10  ;;  %v1828_v23 = vpop.f32.mrb[25].mxu1 }
 0x1b7   :  { %v4380_v27 = vpop.f32.mrb[44].mxu0  ;;  %v1829_v19 = vadd.f32 %v1828_v23, %v1540_v13  ;;  %v2959_v20 = vpop.f32.mrb[26].mxu1  ;;  %3100 = vmatpush3.bf16.msra.mxu1 %v3099_v29 }
 0x1b8   :  { %v1613_v21 = vpop.f32.mrb[45].mxu0  ;;  %v1840_v5 = vadd.f32 %v2959_v20, %v1551_v18  ;;  %v1831_v7 = vpop.f32.mrb[27].mxu1  ;;  %v2073_v32 = vmax.f32 %v1837_v60, 0.0  ;;  %3101 = vmatprep.subr.bf16.mxu1 %v3238_v4 }
 0x1b9   :  { %v2071_v38 = vmax.f32 %v1829_v19, 0.0  ;;  %v4382_v30 = vpop.f32.mrb[46].mxu0  ;;  %v1832_v54 = vadd.f32 %v1831_v7, %v1543_v12 }
 0x1ba   :  { %v1616_v47 = vpop.f32.mrb[47].mxu0  ;;  %v2074_v25 = vmax.f32 %v1840_v5, 0.0 }
 0x1bb   :  { %v2135_v48 = vadd.f32 %v2134_v1, %v2071_v38  ;;  %v2072_v36 = vmax.f32 %v1832_v54, 0.0  ;;  %v1580_v38 = vadd.f32 %v4347_v28, %v4322_v55  ;;  %v1572_v54 = vadd.f32 %v4347_v28, %v4308_v58 }
 0x1bd   :  { %v2136_v39 = vadd.f32 %v2135_v48, %v2072_v36  ;;  %v1583_v36 = vadd.f32 %v4347_v28, %v4326_v9  ;;  %v2227_v9 = vld [vmem:[%s4634_s4 + $0x50] sm:$0xff] }
 0x1bf   :  { %v2137_v37 = vadd.f32 %v2136_v39, %v2073_v32  ;;  %v4384_v43 = vpop.f32.mrb[48].mxu0 }
 0x1c0   :  { %v1621_v0 = vpop.f32.mrb[49].mxu0 }
 0x1c1   :  { %v4390_v51 = vpop.f32.mrb[50].mxu0  ;;  %v2962_v14 = vpop.f32.mrb[28].mxu1  ;;  %v2138_v46 = vadd.f32 %v2137_v37, %v2074_v25  ;;  %v1575_v25 = vadd.f32 %v4347_v28, %v4312_v40 }
 0x1c2   :  { %v1624_v44 = vpop.f32.mrb[51].mxu0  ;;  %v1853_v6 = vadd.f32 %v2962_v14, %v1564_v22  ;;  %v1844_v56 = vpop.f32.mrb[29].mxu1 }
 0x1c3   :  { %v1845_v59 = vadd.f32 %v1844_v56, %v1556_v49  ;;  %v2963_v10 = vpop.f32.mrb[30].mxu1 }
 0x1c4   :  { %v1856_v13 = vadd.f32 %v2963_v10, %v1567_v53  ;;  %v1847_v17 = vpop.f32.mrb[31].mxu1  ;;  %v2077_v19 = vmax.f32 %v1853_v6, 0.0  ;;  %v3102_v53 = vpack.c.bf16 %v2228_v26, %v2227_v9  ;;  %v1615_v9 = vadd.f32 %v4347_v28, %v4382_v30 }
 0x1c5   :  { %v2075_v1 = vmax.f32 %v1845_v59, 0.0  ;;  %v1848_v18 = vadd.f32 %v1847_v17, %v1559_v16 }
 0x1c6   :  { %v2078_v34 = vmax.f32 %v1856_v13, 0.0  ;;  %3103 = vmatpush3.bf16.msra.mxu1 %v3102_v53  ;;  %v1596_v13 = vadd.f32 %v4347_v28, %v4349_v33 }
 0x1c7   :  { %v2139_v60 = vadd.f32 %v2138_v46, %v2075_v1  ;;  %v2076_v23 = vmax.f32 %v1848_v18, 0.0  ;;  %v4403_v12 = vpop.f32.mrb[52].mxu0  ;;  %3104 = vmatprep.subr.bf16.mxu1 %v3238_v4  ;;  %v1588_v1 = vadd.f32 %v4347_v28, %v4331_v63 }
 0x1c8   :  { %v1629_v57 = vpop.f32.mrb[53].mxu0 }
 0x1c9   :  { %v2140_v20 = vadd.f32 %v2139_v60, %v2076_v23  ;;  %v4405_v21 = vpop.f32.mrb[54].mxu0  ;;  %v1599_v57 = vadd.f32 %v4347_v28, %v4355_v50 }
 0x1ca   :  { %v1632_v5 = vpop.f32.mrb[55].mxu0 }
 0x1cb   :  { %v2141_v7 = vadd.f32 %v2140_v20, %v2077_v19 }
 0x1cd   :  { %v2966_v47 = vpop.f32.mrb[32].mxu1  ;;  %v2142_v48 = vadd.f32 %v2141_v7, %v2078_v34  ;;  %v1591_v34 = vadd.f32 %v4347_v28, %v4341_v61  ;;  %v1612_v61 = vadd.f32 %v4347_v28, %v4380_v27 }
 0x1ce   :  { %v1869_v32 = vadd.f32 %v2966_v47, %v1580_v38  ;;  %v1860_v39 = vpop.f32.mrb[33].mxu1 }
 0x1cf   :  { %v4415_v37 = vpop.f32.mrb[56].mxu0  ;;  %v1861_v22 = vadd.f32 %v1860_v39, %v1572_v54  ;;  %v2967_v0 = vpop.f32.mrb[34].mxu1 }
 0x1d0   :  { %v1637_v49 = vpop.f32.mrb[57].mxu0  ;;  %v1872_v14 = vadd.f32 %v2967_v0, %v1583_v36  ;;  %v1863_v55 = vpop.f32.mrb[35].mxu1  ;;  %v2081_v56 = vmax.f32 %v1869_v32, 0.0 }
 0x1d1   :  { %v2079_v46 = vmax.f32 %v1861_v22, 0.0  ;;  %v4417_v8 = vpop.f32.mrb[58].mxu0  ;;  %v1864_v58 = vadd.f32 %v1863_v55, %v1575_v25 }
 0x1d2   :  { %v1640_v40 = vpop.f32.mrb[59].mxu0  ;;  %v2082_v16 = vmax.f32 %v1872_v14, 0.0 }
 0x1d3   :  { %v2143_v44 = vadd.f32 %v2142_v48, %v2079_v46  ;;  %v2080_v6 = vmax.f32 %v1864_v58, 0.0  ;;  %v1604_v46 = vadd.f32 %v4347_v28, %v4367_v52 }
 0x1d5   :  { %v2144_v29 = vadd.f32 %v2143_v44, %v2080_v6  ;;  %v1607_v44 = vadd.f32 %v4347_v28, %v4370_v2  ;;  %v2229_v2 = vld [vmem:[%s4634_s4 + $0x60] sm:$0xff] }
 0x1d7   :  { %v2145_v59 = vadd.f32 %v2144_v29, %v2081_v56  ;;  %v4426_v10 = vpop.f32.mrb[60].mxu0 }
 0x1d8   :  { %v1645_v17 = vpop.f32.mrb[61].mxu0 }
 0x1d9   :  { %v4432_v18 = vpop.f32.mrb[62].mxu0  ;;  %v2970_v60 = vpop.f32.mrb[36].mxu1  ;;  %v2146_v23 = vadd.f32 %v2145_v59, %v2082_v16 }
 0x1da   :  { %v1648_v19 = vpop.f32.mrb[63].mxu0  ;;  %v1885_v20 = vadd.f32 %v2970_v60, %v1596_v13  ;;  %v1876_v5 = vpop.f32.mrb[37].mxu1 }
 0x1db   :  { %v1877_v7 = vadd.f32 %v1876_v5, %v1588_v1  ;;  %v2971_v38 = vpop.f32.mrb[38].mxu1  ;;  %v3239_v1 = vmov 0.0   ;;  %v2231_v5 = vld [vmem:[%s4634_s4 + $0x70] sm:$0xff] }
 0x1dc   :  { %v1888_v33 = vadd.f32 %v2971_v38, %v1599_v57  ;;  %v1879_v54 = vpop.f32.mrb[39].mxu1  ;;  %v2085_v25 = vmax.f32 %v1885_v20, 0.0  ;;  %38 = vst [vmem:[#allocation2] sm:$0x3] %v3239_v1  ;;  %v2230_v20 = vld [vmem:[%s4634_s4 + $0x68] sm:$0xff]  ;;  %3048 = vmatprep.mubr.msk.f32.mxu1 %vm3240_vm0, %v3239_v1 }
 0x1dd   :  { %v2083_v47 = vmax.f32 %v1877_v7, 0.0  ;;  %v1880_v48 = vadd.f32 %v1879_v54, %v1591_v34  ;;  %v2232_v54 = vld [vmem:[%s4634_s4 + $0x78] sm:$0xff] }
 0x1de   :  { %v2086_v49 = vmax.f32 %v1888_v33, 0.0  ;;  %v3105_v33 = vpack.c.bf16 %v2230_v20, %v2229_v2  ;;  %v1639_v20 = vadd.f32 %v4347_v28, %v4417_v8 }
 0x1df   :  { %v2147_v63 = vadd.f32 %v2146_v23, %v2083_v47  ;;  %v2084_v36 = vmax.f32 %v1880_v48, 0.0  ;;  %v4438_v32 = vpop.f32.mrb[64].mxu0  ;;  %v1628_v47 = vadd.f32 %v4347_v28, %v4403_v12  ;;  %v1623_v12 = vadd.f32 %v4347_v28, %v4390_v51 }
 0x1e0   :  { %v1653_v39 = vpop.f32.mrb[65].mxu0  ;;  %3106 = vmatpush3.bf16.msra.mxu1 %v3105_v33 }
 0x1e1   :  { %v2148_v22 = vadd.f32 %v2147_v63, %v2084_v36  ;;  %v4440_v50 = vpop.f32.mrb[66].mxu0  ;;  %v1620_v63 = vadd.f32 %v4347_v28, %v4384_v43  ;;  %3107 = vmatprep.subr.bf16.mxu1 %v3238_v4 }
 0x1e2   :  { %v1656_v0 = vpop.f32.mrb[67].mxu0 }
 0x1e3   :  { %v2149_v14 = vadd.f32 %v2148_v22, %v2085_v25  ;;  %v3108_v22 = vpack.c.bf16 %v2232_v54, %v2231_v5  ;;  %v1631_v0 = vadd.f32 %v4347_v28, %v4405_v21 }
 0x1e5   :  { %v2150_v55 = vadd.f32 %v2149_v14, %v2086_v49  ;;  %3109 = vmatpush3.bf16.msra.mxu1 %v3108_v22 }
 0x1e6   :  { %v2974_v58 = vpop.f32.mrb[40].mxu1  ;;  %3110 = vmatprep.subr.bf16.mxu1 %v3238_v4 }
 0x1e7   :  { %v1901_v26 = vadd.f32 %v2974_v58, %v1612_v61  ;;  %v4448_v40 = vpop.f32.mrb[68].mxu0  ;;  %v1892_v53 = vpop.f32.mrb[41].mxu1 }
 0x1e8   :  { %v1893_v6 = vadd.f32 %v1892_v53, %v1604_v46  ;;  %v1661_v56 = vpop.f32.mrb[69].mxu0  ;;  %v2975_v29 = vpop.f32.mrb[42].mxu1  ;;  %v1660_v8 = vadd.f32 %v4347_v28, %v4448_v40 }
 0x1e9   :  { %v1904_v16 = vadd.f32 %v2975_v29, %v1615_v9  ;;  %v4452_v27 = vpop.f32.mrb[70].mxu0  ;;  %v1895_v59 = vpop.f32.mrb[43].mxu1  ;;  %v2089_v23 = vmax.f32 %v1901_v26, 0.0 }
 0x1ea   :  { %v2087_v13 = vmax.f32 %v1893_v6, 0.0  ;;  %v1896_v52 = vadd.f32 %v1895_v59, %v1607_v44  ;;  %v1664_v17 = vpop.f32.mrb[71].mxu0 }
 0x1eb   :  { %v2090_v34 = vmax.f32 %v1904_v16, 0.0 }
 0x1ec   :  { %v2151_v30 = vadd.f32 %v2150_v55, %v2087_v13  ;;  %v2088_v60 = vmax.f32 %v1896_v52, 0.0  ;;  %v1644_v13 = vadd.f32 %v4347_v28, %v4426_v10  ;;  %v1636_v52 = vadd.f32 %v4347_v28, %v4415_v37 }
 0x1ee   :  { %v2152_v57 = vadd.f32 %v2151_v30, %v2088_v60  ;;  %v1647_v60 = vadd.f32 %v4347_v28, %v4432_v18 }
 0x1ef   :  { %v4455_v19 = vpop.f32.mrb[72].mxu0 }
 0x1f0   :  { %v2153_v7 = vadd.f32 %v2152_v57, %v2089_v23  ;;  %v1669_v38 = vpop.f32.mrb[73].mxu0 }
 0x1f1   :  { %v4471_v48 = vpop.f32.mrb[74].mxu0 }
 0x1f2   :  { %v1672_v36 = vpop.f32.mrb[75].mxu0  ;;  %v2978_v39 = vpop.f32.mrb[44].mxu1  ;;  %v2154_v25 = vadd.f32 %v2153_v7, %v2090_v34 }
 0x1f3   :  { %v1917_v49 = vadd.f32 %v2978_v39, %v1628_v47  ;;  %v1908_v14 = vpop.f32.mrb[45].mxu1 }
 0x1f4   :  { %v1909_v61 = vadd.f32 %v1908_v14, %v1620_v63  ;;  %v2979_v55 = vpop.f32.mrb[46].mxu1 }
 0x1f5   :  { %v1920_v46 = vadd.f32 %v2979_v55, %v1631_v0  ;;  %v1911_v58 = vpop.f32.mrb[47].mxu1  ;;  %v2093_v56 = vmax.f32 %v1917_v49, 0.0 }
 0x1f6   :  { %v2091_v43 = vmax.f32 %v1909_v61, 0.0  ;;  %v1912_v9 = vadd.f32 %v1911_v58, %v1623_v12  ;;  %v1652_v12 = vadd.f32 %v4347_v28, %v4438_v32  ;;  %v1663_v58 = vadd.f32 %v4347_v28, %v4452_v27 }
 0x1f7   :  { %v1675_v26 = vpop.f32.mrb[76].mxu0  ;;  %v2094_v16 = vmax.f32 %v1920_v46, 0.0 }
 0x1f8   :  { %v2155_v21 = vadd.f32 %v2154_v25, %v2091_v43  ;;  %v2092_v53 = vmax.f32 %v1912_v9, 0.0  ;;  %v1677_v44 = vpop.f32.mrb[77].mxu0 }
 0x1f9   :  { %v1678_v6 = vpop.f32.mrb[78].mxu0 }
 0x1fa   :  { %v2156_v51 = vadd.f32 %v2155_v21, %v2092_v53  ;;  %v1680_v29 = vpop.f32.mrb[79].mxu0  ;;  %v1655_v21 = vadd.f32 %v4347_v28, %v4440_v50  ;;  %v1668_v50 = vadd.f32 %v4347_v28, %v4455_v19 }
 0x1fc   :  { %v2157_v59 = vadd.f32 %v2156_v51, %v2093_v56 }
 0x1fe   :  { %v2982_v17 = vpop.f32.mrb[48].mxu1  ;;  %v2158_v30 = vadd.f32 %v2157_v59, %v2094_v16 }
 0x1ff   :  { %v1933_v23 = vadd.f32 %v2982_v17, %v1644_v13  ;;  %v4489_v57 = vpop.f32.mrb[80].mxu0  ;;  %v1924_v2 = vpop.f32.mrb[49].mxu1 }
 0x200   :  { %v1925_v5 = vadd.f32 %v1924_v2, %v1636_v52  ;;  %v1685_v34 = vpop.f32.mrb[81].mxu0  ;;  %v2983_v7 = vpop.f32.mrb[50].mxu1 }
 0x201   :  { %v1936_v38 = vadd.f32 %v2983_v7, %v1647_v60  ;;  %v4493_v10 = vpop.f32.mrb[82].mxu0  ;;  %v1927_v33 = vpop.f32.mrb[51].mxu1  ;;  %v2097_v18 = vmax.f32 %v1933_v23, 0.0  ;;  %v1676_v23 = vadd.f32 %v4347_v28, %v1675_v26 }
 0x202   :  { %v2095_v37 = vmax.f32 %v1925_v5, 0.0  ;;  %v1928_v54 = vadd.f32 %v1927_v33, %v1639_v20  ;;  %v1688_v47 = vpop.f32.mrb[83].mxu0  ;;  %v1679_v5 = vadd.f32 %v4347_v28, %v1678_v6 }
 0x203   :  { %v2098_v22 = vmax.f32 %v1936_v38, 0.0  ;;  %v1671_v38 = vadd.f32 %v4347_v28, %v4471_v48  ;;  %v1684_v48 = vadd.f32 %v4347_v28, %v4489_v57 }
 0x204   :  { %v2159_v63 = vadd.f32 %v2158_v30, %v2095_v37  ;;  %v2096_v36 = vmax.f32 %v1928_v54, 0.0 }
 0x206   :  { %v2160_v39 = vadd.f32 %v2159_v63, %v2096_v36 }
 0x207   :  { %v1691_v25 = vpop.f32.mrb[84].mxu0 }
 0x208   :  { %v2161_v0 = vadd.f32 %v2160_v39, %v2097_v18  ;;  %v1693_v49 = vpop.f32.mrb[85].mxu0 }
 0x209   :  { %v1694_v14 = vpop.f32.mrb[86].mxu0 }
 0x20a   :  { %v4499_v61 = vadd.f32 %v2161_v0, %v2098_v22  ;;  %v1696_v55 = vpop.f32.mrb[87].mxu0  ;;  %v2986_v46 = vpop.f32.mrb[52].mxu1 }
 0x20b   :  { %v1949_v43 = vadd.f32 %v2986_v46, %v1660_v8  ;;  %v1940_v9 = vpop.f32.mrb[53].mxu1  ;;  %v1692_v55 = vadd.f32 %v4347_v28, %v1691_v25 }
 0x20c   :  { %v1941_v53 = vadd.f32 %v1940_v9, %v1652_v12  ;;  %v2987_v44 = vpop.f32.mrb[54].mxu1 }
 0x20d   :  { %v1952_v56 = vadd.f32 %v2987_v44, %v1663_v58  ;;  %v1943_v40 = vpop.f32.mrb[55].mxu1  ;;  %v2101_v52 = vmax.f32 %v1949_v43, 0.0  ;;  %v1695_v43 = vadd.f32 %v4347_v28, %v1694_v14 }
 0x20e   :  { %v1944_v51 = vadd.f32 %v1943_v40, %v1655_v21  ;;  %v2099_v16 = vmax.f32 %v1941_v53, 0.0  ;;  %v1687_v53 = vadd.f32 %v4347_v28, %v4493_v10 }
 0x20f   :  { %v1699_v29 = vpop.f32.mrb[88].mxu0  ;;  %v2102_v60 = vmax.f32 %v1952_v56, 0.0 }
 0x210   :  { %v2100_v32 = vmax.f32 %v1944_v51, 0.0  ;;  %v1701_v59 = vpop.f32.mrb[89].mxu0  ;;  %v1700_v10 = vadd.f32 %v4347_v28, %v1699_v29 }
 0x211   :  { %v1702_v13 = vpop.f32.mrb[90].mxu0 }
 0x212   :  { %v2169_v17 = vadd.f32 %v2100_v32, %v2099_v16  ;;  %v1704_v30 = vpop.f32.mrb[91].mxu0 }
 0x214   :  { %v2170_v27 = vadd.f32 %v2169_v17, %v2101_v52 }
 0x216   :  { %v2990_v2 = vpop.f32.mrb[56].mxu1  ;;  %v2171_v20 = vadd.f32 %v2170_v27, %v2102_v60 }
 0x217   :  { %v1965_v34 = vadd.f32 %v2990_v2, %v1676_v23  ;;  %v1956_v7 = vpop.f32.mrb[57].mxu1 }
 0x218   :  { %v1957_v33 = vadd.f32 %v1956_v7, %v1668_v50  ;;  %v2991_v37 = vpop.f32.mrb[58].mxu1 }
 0x219   :  { %v1968_v54 = vadd.f32 %v2991_v37, %v1679_v5  ;;  %v1959_v47 = vpop.f32.mrb[59].mxu1  ;;  %v2105_v0 = vmax.f32 %v1965_v34, 0.0 }
 0x21a   :  { %v2103_v63 = vmax.f32 %v1957_v33, 0.0  ;;  %v1960_v36 = vadd.f32 %v1959_v47, %v1671_v38  ;;  %v1703_v38 = vadd.f32 %v4347_v28, %v1702_v13 }
 0x21b   :  { %v1707_v18 = vpop.f32.mrb[92].mxu0  ;;  %v2106_v6 = vmax.f32 %v1968_v54, 0.0 }
 0x21c   :  { %v2172_v26 = vadd.f32 %v2171_v20, %v2103_v63  ;;  %v2104_v39 = vmax.f32 %v1960_v36, 0.0  ;;  %v1709_v22 = vpop.f32.mrb[93].mxu0  ;;  %v1708_v50 = vadd.f32 %v4347_v28, %v1707_v18 }
 0x21d   :  { %v1710_v19 = vpop.f32.mrb[94].mxu0 }
 0x21e   :  { %v2173_v49 = vadd.f32 %v2172_v26, %v2104_v39  ;;  %v1712_v8 = vpop.f32.mrb[95].mxu0  ;;  %v1711_v5 = vadd.f32 %v4347_v28, %v1710_v19 }
 0x220   :  { %v2174_v12 = vadd.f32 %v2173_v49, %v2105_v0 }
 0x222   :  { %v2994_v46 = vpop.f32.mrb[60].mxu1  ;;  %v2175_v58 = vadd.f32 %v2174_v12, %v2106_v6 }
 0x223   :  { %v1981_v9 = vadd.f32 %v2994_v46, %v1692_v55  ;;  %v1972_v21 = vpop.f32.mrb[61].mxu1 }
 0x224   :  { %v1973_v44 = vadd.f32 %v1972_v21, %v1684_v48  ;;  %v2995_v56 = vpop.f32.mrb[62].mxu1 }
 0x225   :  { %v1984_v40 = vadd.f32 %v2995_v56, %v1695_v43  ;;  %v1975_v51 = vpop.f32.mrb[63].mxu1  ;;  %v2109_v30 = vmax.f32 %v1981_v9, 0.0 }
 0x226   :  { %v2107_v16 = vmax.f32 %v1973_v44, 0.0  ;;  %v1976_v32 = vadd.f32 %v1975_v51, %v1687_v53 }
 0x227   :  { %v1715_v59 = vpop.f32.mrb[96].mxu0  ;;  %v2110_v14 = vmax.f32 %v1984_v40, 0.0 }
 0x228   :  { %v2176_v25 = vadd.f32 %v2175_v58, %v2107_v16  ;;  %v2108_v52 = vmax.f32 %v1976_v32, 0.0  ;;  %v1717_v17 = vpop.f32.mrb[97].mxu0  ;;  %v1716_v13 = vadd.f32 %v4347_v28, %v1715_v59 }
 0x229   :  { %v1718_v57 = vpop.f32.mrb[98].mxu0 }
 0x22a   :  { %v2177_v60 = vadd.f32 %v2176_v25, %v2108_v52  ;;  %v1720_v27 = vpop.f32.mrb[99].mxu0  ;;  %v1719_v9 = vadd.f32 %v4347_v28, %v1718_v57 }
 0x22c   :  { %v2178_v23 = vadd.f32 %v2177_v60, %v2109_v30 }
 0x22e   :  { %v2998_v2 = vpop.f32.mrb[64].mxu1  ;;  %v2179_v20 = vadd.f32 %v2178_v23, %v2110_v14  ;;  %v1740_v23 = vadd.f32 %v4347_v28, %v4285_v15  ;;  %v1756_v15 = vadd.f32 %v4347_v28, %v4306_v24 }
 0x22f   :  { %v1997_v34 = vadd.f32 %v2998_v2, %v1708_v50  ;;  %v1988_v7 = vpop.f32.mrb[65].mxu1  ;;  %v1743_v2 = vadd.f32 %v4347_v28, %v4295_v35 }
 0x230   :  { %v1989_v33 = vadd.f32 %v1988_v7, %v1700_v10  ;;  %v2999_v37 = vpop.f32.mrb[66].mxu1 }
 0x231   :  { %v2000_v54 = vadd.f32 %v2999_v37, %v1711_v5  ;;  %v1991_v47 = vpop.f32.mrb[67].mxu1  ;;  %v2113_v29 = vmax.f32 %v1997_v34, 0.0 }
 0x232   :  { %v2111_v63 = vmax.f32 %v1989_v33, 0.0  ;;  %v1992_v36 = vadd.f32 %v1991_v47, %v1703_v38 }
 0x233   :  { %v1723_v26 = vpop.f32.mrb[100].mxu0  ;;  %v2114_v6 = vmax.f32 %v2000_v54, 0.0 }
 0x234   :  { %v2180_v39 = vadd.f32 %v2179_v20, %v2111_v63  ;;  %v2112_v22 = vmax.f32 %v1992_v36, 0.0  ;;  %v1725_v18 = vpop.f32.mrb[101].mxu0  ;;  %v1724_v12 = vadd.f32 %v4347_v28, %v1723_v26  ;;  %v1748_v26 = vadd.f32 %v4347_v28, %v4298_v41 }
 0x235   :  { %v1726_v0 = vpop.f32.mrb[102].mxu0  ;;  %v1759_v18 = vadd.f32 %v4347_v28, %v4310_v11  ;;  %v1764_v11 = vadd.f32 %v4347_v28, %v4314_v3 }
 0x236   :  { %v2181_v49 = vadd.f32 %v2180_v39, %v2112_v22  ;;  %v1728_v8 = vpop.f32.mrb[103].mxu0  ;;  %v1727_v46 = vadd.f32 %v4347_v28, %v1726_v0 }
 0x238   :  { %v2182_v19 = vadd.f32 %v2181_v49, %v2113_v29  ;;  %v1751_v49 = vadd.f32 %v4347_v28, %v4302_v45 }
 0x23a   :  { %v2183_v55 = vadd.f32 %v2182_v19, %v2114_v6  ;;  %v3002_v48 = vpop.f32.mrb[68].mxu1 }
 0x23b   :  { %v2013_v58 = vadd.f32 %v3002_v48, %v1724_v12  ;;  %v2004_v43 = vpop.f32.mrb[69].mxu1 }
 0x23c   :  { %v2005_v21 = vadd.f32 %v2004_v43, %v1716_v13  ;;  %v3003_v53 = vpop.f32.mrb[70].mxu1  ;;  %v1772_v43 = vadd.f32 %v4347_v28, %v4329_v62 }
 0x23d   :  { %v2016_v44 = vadd.f32 %v3003_v53, %v1727_v46  ;;  %v2007_v56 = vpop.f32.mrb[71].mxu1  ;;  %v2117_v30 = vmax.f32 %v2013_v58, 0.0  ;;  %v1775_v53 = vadd.f32 %v4347_v28, %v4333_v31 }
 0x23e   :  { %v2115_v40 = vmax.f32 %v2005_v21, 0.0  ;;  %v2008_v51 = vadd.f32 %v2007_v56, %v1719_v9 }
 0x23f   :  { %v1731_v16 = vpop.f32.mrb[104].mxu0  ;;  %v2118_v27 = vmax.f32 %v2016_v44, 0.0 }
 0x240   :  { %v2184_v32 = vadd.f32 %v2183_v55, %v2115_v40  ;;  %v2116_v25 = vmax.f32 %v2008_v51, 0.0  ;;  %v1733_v52 = vpop.f32.mrb[105].mxu0  ;;  %v1732_v57 = vadd.f32 %v4347_v28, %v1731_v16  ;;  %v1767_v40 = vadd.f32 %v4347_v28, %v4324_v42 }
 0x241   :  { %v1734_v17 = vpop.f32.mrb[106].mxu0 }
 0x242   :  { %v2185_v59 = vadd.f32 %v2184_v32, %v2116_v25  ;;  %v1736_v60 = vpop.f32.mrb[107].mxu0  ;;  %v1735_v34 = vadd.f32 %v4347_v28, %v1734_v17  ;;  %v2163_v17 = vrot.slane %v4499_v61, 4 }
 0x244   :  { %v2186_v14 = vadd.f32 %v2185_v59, %v2117_v30  ;;  %v2164_v31 = vadd.f32 %v2163_v17, %v4499_v61  ;;  %v2310_v61 = vld [vmem:[%s4635_s5] sm:$0xff] }
 0x246   :  { %v3006_v50 = vpop.f32.mrb[72].mxu1  ;;  %v2187_v10 = vadd.f32 %v2186_v14, %v2118_v27  ;;  %v2165_v42 = vrot.slane %v2164_v31, 2 }
 0x247   :  { %v2029_v20 = vadd.f32 %v3006_v50, %v1740_v23  ;;  %v2020_v5 = vpop.f32.mrb[73].mxu1 }
 0x248   :  { %v2021_v7 = vadd.f32 %v2020_v5, %v1732_v57  ;;  %v3007_v38 = vpop.f32.mrb[74].mxu1 }
 0x249   :  { %v2032_v33 = vadd.f32 %v3007_v38, %v1743_v2  ;;  %v2023_v37 = vpop.f32.mrb[75].mxu1  ;;  %v2121_v39 = vmax.f32 %v2029_v20, 0.0  ;;  %v2166_v2 = vadd.f32 %v2165_v42, %v2164_v31  ;;  %v2861_v42 = vld [vmem:[%s4638_s8] ss:$0 sm:$0xff] }
 0x24a   :  { %v2119_v54 = vmax.f32 %v2021_v7, 0.0  ;;  %v2024_v47 = vadd.f32 %v2023_v37, %v1735_v34 }
 0x24b   :  { %v2122_v8 = vmax.f32 %v2032_v33, 0.0  ;;  %v2167_v34 = vrot.slane %v2166_v2, 1 }
 0x24c   :  { %v2188_v63 = vadd.f32 %v2187_v10, %v2119_v54  ;;  %v2120_v36 = vmax.f32 %v2024_v47, 0.0  ;;  %v2131_v54 = vld [vmem:[#allocation2] sm:$0x3] }
 0x24d   :  { %v2168_v33 = vadd.f32 %v2167_v34, %v2166_v2 }
 0x24e   :  { %v2189_v35 = vadd.f32 %v2188_v63, %v2120_v36  ;;  %v3010_v22 = vpop.f32.mrb[76].mxu1  ;;  %v2311_v36 = vld [vmem:[%s4635_s5 + $0x8] sm:$0xff] }
 0x24f   :  { %v2045_v0 = vadd.f32 %v3010_v22, %v1756_v15  ;;  %v2036_v29 = vpop.f32.mrb[77].mxu1  ;;  %v3111_v15 = vpack.c.bf16 %v2311_v36, %v2310_v61 }
 0x250   :  { %v2190_v6 = vadd.f32 %v2189_v35, %v2121_v39  ;;  %v2037_v19 = vadd.f32 %v2036_v29, %v1748_v26  ;;  %v3011_v12 = vpop.f32.mrb[78].mxu1  ;;  %v2312_v26 = vld [vmem:[%s4635_s5 + $0x10] sm:$0xff]  ;;  %v2313_v39 = vld [vmem:[%s4635_s5 + $0x18] sm:$0xff] }
 0x251   :  { %v2048_v55 = vadd.f32 %v3011_v12, %v1759_v18  ;;  %v2039_v24 = vpop.f32.mrb[79].mxu1  ;;  %v2125_v9 = vmax.f32 %v2045_v0, 0.0  ;;  %v3114_v22 = vpack.c.bf16 %v2313_v39, %v2312_v26  ;;  %v2314_v18 = vld [vmem:[%s4635_s5 + $0x20] sm:$0xff]  ;;  %v2315_v0 = vld [vmem:[%s4635_s5 + $0x28] sm:$0xff] }
 0x252   :  { %v2123_v13 = vmax.f32 %v2037_v19, 0.0  ;;  %v2191_v48 = vadd.f32 %v2190_v6, %v2122_v8  ;;  %v2040_v41 = vadd.f32 %v2039_v24, %v1751_v49  ;;  %v3117_v29 = vpack.c.bf16 %v2315_v0, %v2314_v18  ;;  %v2317_v49 = vld [vmem:[%s4635_s5 + $0x38] sm:$0xff]  ;;  %v2318_v6 = vld [vmem:[%s4635_s5 + $0x40] sm:$0xff]  ;;  %v2319_v19 = vld [vmem:[%s4635_s5 + $0x48] sm:$0xff] }
 0x253   :  { %v2126_v51 = vmax.f32 %v2048_v55, 0.0  ;;  %v3123_v12 = vpack.c.bf16 %v2319_v19, %v2318_v6  ;;  %v2320_v55 = vld [vmem:[%s4635_s5 + $0x50] sm:$0xff]  ;;  %v2321_v24 = vld [vmem:[%s4635_s5 + $0x58] sm:$0xff] }
 0x254   :  { %v2192_v46 = vadd.f32 %v2191_v48, %v2123_v13  ;;  %v2124_v58 = vmax.f32 %v2040_v41, 0.0  ;;  %v3126_v13 = vpack.c.bf16 %v2321_v24, %v2320_v55  ;;  %v2322_v48 = vld [vmem:[%s4635_s5 + $0x60] sm:$0xff]  ;;  %v2323_v41 = vld [vmem:[%s4635_s5 + $0x68] sm:$0xff] }
 0x256   :  { %v2193_v21 = vadd.f32 %v2192_v46, %v2124_v58  ;;  %v3129_v46 = vpack.c.bf16 %v2323_v41, %v2322_v48  ;;  %v2324_v58 = vld [vmem:[%s4635_s5 + $0x70] sm:$0xff] }
 0x257   :  { %v3014_v45 = vpop.f32.mrb[80].mxu1 }
 0x258   :  { %v2061_v44 = vadd.f32 %v3014_v45, %v1772_v43  ;;  %v2052_v56 = vpop.f32.mrb[81].mxu1  ;;  %v2194_v16 = vadd.f32 %v2193_v21, %v2125_v9  ;;  %v2325_v43 = vld [vmem:[%s4635_s5 + $0x78] sm:$0xff]  ;;  %v2233_v9 = vld [vmem:[%s4631_s1] sm:$0x3] }
 0x259   :  { %v2053_v32 = vadd.f32 %v2052_v56, %v1764_v11  ;;  %v3015_v25 = vpop.f32.mrb[82].mxu1  ;;  %v3132_v11 = vpack.c.bf16 %v2325_v43, %v2324_v58 }
 0x25a   :  { %v2064_v52 = vadd.f32 %v3015_v25, %v1775_v53  ;;  %v2055_v62 = vpop.f32.mrb[83].mxu1  ;;  %v2195_v30 = vadd.f32 %v2194_v16, %v2126_v51  ;;  %v2129_v14 = vmax.f32 %v2061_v44, 0.0 }
 0x25b   :  { %v2127_v3 = vmax.f32 %v2053_v32, 0.0  ;;  %v2056_v59 = vadd.f32 %v2055_v62, %v1767_v40 }
 0x25c   :  { %v2130_v57 = vmax.f32 %v2064_v52, 0.0 }
 0x25d   :  { %v2196_v60 = vadd.f32 %v2195_v30, %v2127_v3  ;;  %v2128_v27 = vmax.f32 %v2056_v59, 0.0 }
 0x25f   :  { %v2197_v23 = vadd.f32 %v2196_v60, %v2128_v27 }
 0x261   :  { %v2198_v50 = vadd.f32 %v2197_v23, %v2129_v14 }
 0x263   :  { %v2199_v28 = vadd.f32 %v2198_v50, %v2130_v57  ;;  %v2860_v57 = vld [vmem:[%s4637_s7] ss:$0 sm:$0xff] }
 0x265   :  { %v2200_v10 = vrot.slane %v2199_v28, 4 }
 0x267   :  { %v2201_v20 = vadd.f32 %v2200_v10, %v2199_v28 }
 0x269   :  { %v2202_v5 = vrot.slane %v2201_v20, 2 }
 0x26b   :  { %v2203_v7 = vadd.f32 %v2202_v5, %v2201_v20 }
 0x26d   :  { %v2204_v38 = vrot.slane %v2203_v7, 1 }
 0x26f   :  { %v2205_v37 = vadd.f32 %v2204_v38, %v2203_v7 }
 0x271   :  { %v2209_v47 = vsel %vm2208_vm1, %v2205_v37, %v2168_v33 }
 0x272   :  { %v2211_v63 = vadd.f32 %v2209_v47, %v2131_v54 }
 0x274   :  { %2212 = vst [vmem:[#allocation2] sm:$0x3] %v2211_v63 }
 0x27b   :  { %v2216_v35 = vld [vmem:[#allocation2] sm:$0x3] }
 0x27c   :  { %3049 = vmatmul.mubr.f32.vlgmr.msra.gmra.mrb[84].mxu1 %v2216_v35 }
 0x27d   :  { %3112 = vmatpush3.bf16.msra.mxu1 %v3111_v15  ;;  %3083 = vmatprep.mubr.msk.f32.mxu1 %vm3240_vm0, %v3239_v1  ;;  %v2316_v1 = vld [vmem:[%s4635_s5 + $0x30] sm:$0xff] }
 0x27e   :  { %3113 = vmatprep.subr.bf16.mxu1 %v3238_v4  ;;  %v3120_v8 = vpack.c.bf16 %v2317_v49, %v2316_v1 }
 0x281   :  { %3115 = vmatpush3.bf16.msra.mxu1 %v3114_v22 }
 0x282   :  { %3116 = vmatprep.subr.bf16.mxu1 %v3238_v4 }
 0x285   :  { %3118 = vmatpush3.bf16.msra.mxu1 %v3117_v29 }
 0x286   :  { %3119 = vmatprep.subr.bf16.mxu1 %v3238_v4 }
 0x289   :  { %3121 = vmatpush3.bf16.msra.mxu1 %v3120_v8 }
 0x28a   :  { %3122 = vmatprep.subr.bf16.mxu1 %v3238_v4 }
 0x28d   :  { %3124 = vmatpush3.bf16.msra.mxu1 %v3123_v12 }
 0x28e   :  { %3125 = vmatprep.subr.bf16.mxu1 %v3238_v4 }
 0x291   :  { %3127 = vmatpush3.bf16.msra.mxu1 %v3126_v13 }
 0x292   :  { %3128 = vmatprep.subr.bf16.mxu1 %v3238_v4 }
 0x295   :  { %3130 = vmatpush3.bf16.msra.mxu1 %v3129_v46 }
 0x296   :  { %3131 = vmatprep.subr.bf16.mxu1 %v3238_v4  ;;  %v2859_v4 = vld [vmem:[%s4636_s6] ss:$0 sm:$0xff] }
 0x299   :  { %3133 = vmatpush3.bf16.msra.mxu1 %v3132_v11 }
 0x34f   :  { %v2300_v21 = vpop.f32.mrb[84].mxu1 }
 0x350   :  { %v2301_v45 = vadd.f32 %v2300_v21, %v2233_v9  ;;  %v3050_v53 = vpop.f32.mrb[85].mxu1 }
 0x352   :  { %v2305_v44 = vmin.f32 %v2301_v45, 0.0  ;;  %vm2304_vm2 = vcmp.gt.f32.partialorder %v2301_v45, 0.0 }
 0x354   :  { %v2306_v56 = vmul.f32 1.442695, %v2305_v44 }
 0x356   :  { %3198 = vpow2.f32 %v2306_v56 }
 0x360   :  { %v3199_v40 = vpop.eup %3198 }
 0x361   :  { %v2858_v51 = vadd.f32 -1.0, %v3199_v40 }
 0x363   :  { %v2309_v16 = vsel %vm2304_vm2, %v2301_v45, %v2858_v51 }
 0x364   :  { %3084 = vmatmul.mubr.f32.vlgmr.msra.gmra.mrb[86].mxu1 %v2309_v16 }
 0x437   :  { %v2399_v32 = vpop.f32.mrb[86].mxu1 }
 0x438   :  { %v2400_v25 = vadd.f32 %v2859_v4, %v2399_v32  ;;  %v3085_v52 = vpop.f32.mrb[87].mxu1 }
 0x43a   :  { %v2404_v62 = vsel %vm2403_vm3, %v2400_v25, 0.0 }
 0x43b   :  { %2405 = vadd.xlane.f32.xlu0 %v2404_v62 }
 0x4c8   :  { %v2406_v17 = vpop.xlane.xlu0 %2405 }
 0x4c9   :  { %v2408_v3 = vmul.f32 0.0078125, %v2406_v17 }
 0x4cb   :  { %v2409_v30 = vsub.f32 %v2400_v25, %v2408_v3 }
 0x4cd   :  { %v2410_v59 = vmul.f32 %v2409_v30, %v2409_v30 }
 0x4cf   :  { %v2411_v60 = vsel %vm2403_vm3, %v2410_v59, 0.0 }
 0x4d0   :  { %2412 = vadd.xlane.f32.xlu1 %v2411_v60 }
 0x55d   :  { %v2413_v27 = vpop.xlane.xlu1 %2412 }
 0x55e   :  { %v2414_v31 = vmul.f32 0.0078125, %v2413_v27 }
 0x560   :  { %v2415_v14 = vadd.f32 1e-05, %v2414_v31 }
 0x562   :  { %3200 = vrsqrt.f32 %v2415_v14 }
 0x56c   :  { %v3201_v23 = vpop.eup %3200 }
 0x56d   :  { %v2417_v50 = vmul.f32 %v3201_v23, %v2409_v30 }
 0x56f   :  { %v2425_v28 = vmul.f32 %v2860_v57, %v2417_v50 }
 0x571   :  { %v2433_v10 = vadd.f32 %v2861_v42, %v2425_v28 }
 0x573   :  { %2434 = vst [vmem:[#allocation3] sm:$0x3] %v2433_v10 }
 0x574   :  { %3223 = shalt.err (!%p3220_p4)
}
 0x575   :  { %s3224_s14 = scalar_lea.hbm %s4639_s9, 32 }
 0x576   :  { %p3225_p5 = scmp.ne.s32.totalorder %s4639_s9, %s3224_s14  ;;  %p3228_p6 = scmp.lt.u32.totalorder %s3224_s14, %s4639_s9 }
 0x578   :  { %p3230_p7 = pnand %p3228_p6, %p3225_p5 }
 0x57a   :  { %3233 = shalt.err (!%p3230_p7)
}
 0x57b   :  { %2444 = dma.vmem_to_hbm [thread:$0]  %s2442_s12, 32, %s4639_s9, [#allocation4]  }
 0x57c   :  { %3234 = dma.done.wait [#allocation4], 32  }
 0x57d   :  { %3235 = vsyncadd [#allocation4], 4294967264 }
 0x57e   :  { %2448 = vsyncpa [#allocation4], 1 }

</bundles_post_ra>
